<compile_context>
chip_gen: v6e
topology: v6e:2x2x1
jax: 0.10.0
libtpu: 0.0.40
codegen_flags: <defaults>
</compile_context>

<pallas_src>
import functools

import jax
import jax.numpy as jnp
from jax import lax
from jax.experimental import pallas as pl
from jax.experimental.pallas import tpu as pltpu

_NEG_INF = -1e30   # finite "minus infinity": exp underflows to exactly 0, no NaN risk


def _attention_pool_kernel(x_ref,                    # (n_tile, M) bf16 tile of X
                           w1t_ref, b1_ref,          # (M, L) bf16, (1, L) f32
                           w2_ref, b2_ref,           # (K, L) bf16, (K, 1) f32
                           s_ref,                    # (K, n_tile) raw-logit tile (out)
                           m_ref, l_ref, acc_ref,    # (K,1),(K,1),(K,M) per-split partials
                           *, n_valid, n_tile, steps_per_split):
    i = pl.program_id(1)                              # position inside this split
    step = pl.program_id(0) * steps_per_split + i     # global (unclamped) tile index
    row0 = step * n_tile                              # first global instance row

    @pl.when(i == 0)
    def _init():
        m_ref[...] = jnp.full_like(m_ref, _NEG_INF)
        l_ref[...] = jnp.zeros_like(l_ref)
        acc_ref[...] = jnp.zeros_like(acc_ref)

    # Zero rows beyond the real bag size (stale VMEM of the partial edge tile /
    # redundant trailing steps) so they cannot pollute the pooling matmul.
    row = row0 + lax.broadcasted_iota(jnp.int32, (n_tile, 1), 0)
    x = jnp.where(row < n_valid, x_ref[...], jnp.zeros((), x_ref.dtype))   # bf16

    # Gating MLP: bf16 MXU inputs, f32 accumulation.
    h = jnp.dot(x, w1t_ref[...], preferred_element_type=jnp.float32) + b1_ref[...]
    h = jnp.tanh(h.astype(jnp.bfloat16))              # bf16 tanh (EUP bf16 on v6e/v7x)
    # Contract L so the logits land directly in (K, n_tile) orientation
    # (lane-dense, no transpose anywhere in the kernel).
    s = lax.dot_general(w2_ref[...], h,
                        dimension_numbers=(((1,), (1,)), ((), ())),
                        preferred_element_type=jnp.float32)
    s = s + b2_ref[...]                               # (K, n_tile) f32

    # Mask instance slots beyond the real bag size.
    col = row0 + lax.broadcasted_iota(jnp.int32, s.shape, 1)
    s = jnp.where(col < n_valid, s, _NEG_INF)

    # Stream raw masked logits out tile-by-tile; they are normalized in the
    # JAX epilogue, so A never has to be VMEM-resident for the whole bag.
    s_ref[...] = s

    # Online-softmax update of the attention-weighted pooling.  The per-split
    # running (m, l, acc) live directly in the resident output blocks.
    m_prev = m_ref[...]
    m_new = jnp.maximum(m_prev, jnp.max(s, axis=1, keepdims=True))
    alpha = jnp.exp(m_prev - m_new)
    p = jnp.exp(s - m_new)                            # (K, n_tile) f32
    l_ref[...] = alpha * l_ref[...] + jnp.sum(p, axis=1, keepdims=True)
    acc_ref[...] = alpha * acc_ref[...] + jnp.dot(
        p.astype(jnp.bfloat16), x, preferred_element_type=jnp.float32)
    m_ref[...] = m_new


def attention_wsi(x, params, *, n_tile=None, n_splits=2, interpret=False):
    """x: (N, M) float bag.  Returns (Y (K, n_labels), A (K, N)), like forward()."""
    w1, b1, w2, b2, wc, bc = params                   # PyTorch-style (out, in) weights
    N, M = x.shape
    L = w1.shape[0]
    K = w2.shape[0]
    n_labels = wc.shape[0]
    if K != 1:
        # The PyTorch classifier Linear(M*K, n_labels) only type-checks on Z of
        # shape (K, M) when K == 1; mirror that restriction.
        raise NotImplementedError("AttentionWSI.forward_single requires K == 1")
    assert wc.shape[1] == M * K

    if n_tile is None:
        # Largest tile whose bf16 X double-buffer stays ~8 MiB: fits the v5e
        # 16 MiB scoped default and v7x's 64 MiB physical VMEM with room for
        # the single-buffered weights; capped by the (128-rounded) bag size.
        n_tile = max(256, min(2048, ((8 << 20) // (4 * M)) // 128 * 128))
        n_tile = min(n_tile, max(128, -(-N // 128) * 128))
    if n_tile % 128:
        raise ValueError("n_tile must be a multiple of 128")

    n_steps = -(-N // n_tile)                         # real tiles covering the bag
    n_splits = max(1, min(n_splits, n_steps))         # 2 feeds both TCs on v7x
    spc = -(-n_steps // n_splits)                     # steps per split (inner grid axis)
    n_pad_out = n_splits * spc * n_tile               # logit slab incl. redundant tiles

    # bf16 MXU inputs prepared wrapper-side (biases stay f32; accumulation is f32).
    x_bf = x.astype(jnp.bfloat16)
    w1t = w1.T.astype(jnp.bfloat16)                   # (M, L)
    b1r = b1.reshape(1, L).astype(jnp.float32)
    w2b = w2.astype(jnp.bfloat16)                     # (K, L)
    b2c = b2.reshape(K, 1).astype(jnp.float32)

    kernel = functools.partial(_attention_pool_kernel, n_valid=N,
                               n_tile=n_tile, steps_per_split=spc)

    def x_index(c, i):
        # Clamp so the (fully masked) redundant trailing steps of the last
        # split re-read the last real block instead of running past X.
        return (jnp.minimum(c * spc + i, n_steps - 1), 0)

    # Constant weight operands: whole-array VMEM residents -> single copy,
    # no double-buffer reservation (reclaimed VMEM goes to a bigger X tile).
    const_spec = pl.BlockSpec(memory_space=pltpu.MemorySpace.VMEM)

    # Explicit VMEM budget (v5e scoped default is only 16 MiB; v7x has 64 MiB physical).
    vmem_est = (2 * n_tile * M * 2                      # X tile, double-buffered, bf16
                + (M * L + K * L) * 2 + 3 * 8 * 128 * 4  # weights + padded small operands
                + 2 * 8 * n_tile * 4                     # logit tile, double-buffered
                + 8 * M * 4 + 2 * 8 * 128 * 4)           # resident acc / m / l blocks
    vmem_limit = int(min(max(2 * vmem_est, 32 << 20), 56 << 20))

    cost = pl.CostEstimate(
        flops=2 * N * M * L + 2 * N * L * K + 2 * N * M * K,
        transcendentals=N * (L + K),
        bytes_accessed=(N * M * 2 + (M * L + K * L) * 2 + (L + K) * 4
                        + n_pad_out * 4 + n_splits * K * (M + 2) * 4))

    s_raw, m_parts, l_parts, acc_parts = pl.pallas_call(
        kernel,
        grid=(n_splits, spc),
        in_specs=[
            pl.BlockSpec((n_tile, M), x_index),          # streamed X tiles (bf16)
            const_spec, const_spec, const_spec, const_spec,
        ],
        out_specs=[
            pl.BlockSpec((K, n_tile), lambda c, i: (0, c * spc + i)),   # raw logits
            pl.BlockSpec((None, K, 1), lambda c, i: (c, 0, 0)),         # m   per split
            pl.BlockSpec((None, K, 1), lambda c, i: (c, 0, 0)),         # l   per split
            pl.BlockSpec((None, K, M), lambda c, i: (c, 0, 0)),         # acc per split
        ],
        out_shape=(
            jax.ShapeDtypeStruct((K, n_pad_out), jnp.float32),
            jax.ShapeDtypeStruct((n_splits, K, 1), jnp.float32),
            jax.ShapeDtypeStruct((n_splits, K, 1), jnp.float32),
            jax.ShapeDtypeStruct((n_splits, K, M), jnp.float32),
        ),
        compiler_params=pltpu.CompilerParams(
            dimension_semantics=("parallel", "arbitrary"),
            vmem_limit_bytes=vmem_limit),
        cost_estimate=cost,
        interpret=interpret,
    )(x_bf, w1t, b1r, w2b, b2c)

    # Tiny pure-JAX epilogue: combine per-split online-softmax partials,
    # normalize A, and run the (K, M) x (M, n_labels) classifier.
    m = jnp.max(m_parts, axis=0)                      # (K, 1)
    wgt = jnp.exp(m_parts - m)                        # (n_splits, K, 1); empty splits -> 0
    l = jnp.sum(wgt * l_parts, axis=0)                # (K, 1)
    acc = jnp.sum(wgt * acc_parts, axis=0)            # (K, M)
    z = acc / l                                       # attention-pooled features
    y = z @ wc.T + bc.reshape(1, n_labels)            # classifier (f32)
    a = jnp.exp(s_raw[:, :N] - m) / l                 # (K, N) softmax weights
    return y, a


def _reference(x, params):
    """Pure-JAX f32 transcription of AttentionBase.forward_single."""
    w1, b1, w2, b2, wc, bc = params
    a = jnp.tanh(x @ w1.T + b1) @ w2.T + b2           # (N, K)
    a = jax.nn.softmax(a.T, axis=1)                   # (K, N)
    z = a @ x                                         # (K, M)
    y = z @ wc.T + bc                                 # (K, n_labels)
    return y, a


def init_params(key, n_features, hidden_layer, n_labels, attention_branches):
    ks = jax.random.split(key, 6)
    sc = 0.05
    w1 = sc * jax.random.normal(ks[0], (hidden_layer, n_features), jnp.float32)
    b1 = sc * jax.random.normal(ks[1], (hidden_layer,), jnp.float32)
    w2 = sc * jax.random.normal(ks[2], (attention_branches, hidden_layer), jnp.float32)
    b2 = sc * jax.random.normal(ks[3], (attention_branches,), jnp.float32)
    wc = sc * jax.random.normal(
        ks[4], (n_labels, n_features * attention_branches), jnp.float32)
    bc = sc * jax.random.normal(ks[5], (n_labels,), jnp.float32)
    return (w1, b1, w2, b2, wc, bc)


if __name__ == "__main__":
    # Module defaults: n_features=512, hidden_layer=128, n_labels=1, branches=1.
    # N=300 with n_tile=128 and n_splits=2 exercises the multi-tile online
    # softmax, the unpadded partial edge tile, a redundant (fully masked) tail
    # step, and the cross-split combine epilogue.
    N, M, L, K, n_labels = 300, 512, 128, 1, 1

    key = jax.random.PRNGKey(0)
    kx, kp = jax.random.split(key)
    x = jax.random.normal(kx, (N, M), jnp.float32)
    params = init_params(kp, M, L, n_labels, K)

    y, a = attention_wsi(x, params, n_tile=128, n_splits=2)
    y = jax.block_until_ready(y)
    a = jax.block_until_ready(a)

    y_exp, a_exp = _reference(x, params)
    assert y.shape == (K, n_labels) and a.shape == (K, N)
    # bf16 MXU inputs -> tolerances relaxed vs the f32 reference.
    assert jnp.allclose(jnp.sum(a, axis=-1), 1.0, atol=1e-3), "softmax not normalized"
    assert jnp.allclose(a, a_exp, atol=2e-3, rtol=5e-2), "A mismatch"
    assert jnp.allclose(y, y_exp, atol=1e-2, rtol=5e-2), "Y mismatch"

    # TODO(synk): calc_loss (BCEWithLogitsLoss), predict_proba and the batched
    # forward_multiwsi path are training/post-processing helpers, not part of
    # AttentionWSI.forward(); intentionally not ported.

    print("KERNEL_OK")
</pallas_src>

<mosaic_0001>
module attributes {stable_mosaic.version = 11 : i64} {
  func.func @_attention_pool_kernel(%arg0: i32, %arg1: i32, %arg2: memref<128x512xbf16, #tpu.memory_space<vmem>>, %arg3: memref<512x128xbf16, #tpu.memory_space<vmem>>, %arg4: memref<1x128xf32, #tpu.memory_space<vmem>>, %arg5: memref<1x128xbf16, #tpu.memory_space<vmem>>, %arg6: memref<1x1xf32, #tpu.memory_space<vmem>>, %arg7: memref<1x128xf32, #tpu.memory_space<vmem>>, %arg8: memref<1x1x1xf32, #tpu.memory_space<vmem>>, %arg9: memref<1x1x1xf32, #tpu.memory_space<vmem>>, %arg10: memref<1x1x512xf32, #tpu.memory_space<vmem>>) attributes {dimension_semantics = [#tpu.dimension_semantics<parallel>, #tpu.dimension_semantics<arbitrary>], iteration_bounds = array<i64: 2, 2>, scalar_prefetch = 0 : i64, scratch_operands = 0 : i64, tpu.core_type = #tpu.core_type<tc>, window_params = [{transform_indices = @transform_0, window_bounds = array<i64: 128, 512>}, {pipeline_mode = #tpu.pipeline_mode<synchronous>, transform_indices = @transform_1, window_bounds = array<i64: 512, 128>}, {pipeline_mode = #tpu.pipeline_mode<synchronous>, transform_indices = @transform_2, window_bounds = array<i64: 1, 128>}, {pipeline_mode = #tpu.pipeline_mode<synchronous>, transform_indices = @transform_3, window_bounds = array<i64: 1, 128>}, {pipeline_mode = #tpu.pipeline_mode<synchronous>, transform_indices = @transform_4, window_bounds = array<i64: 1, 1>}, {transform_indices = @transform_5, window_bounds = array<i64: 1, 128>}, {transform_indices = @transform_6, window_bounds = array<i64: 1, 1, 1>}, {transform_indices = @transform_7, window_bounds = array<i64: 1, 1, 1>}, {transform_indices = @transform_8, window_bounds = array<i64: 1, 1, 512>}]} {
    %c2_i32 = arith.constant 2 : i32
    %0 = arith.muli %arg0, %c2_i32 : i32
    %1 = arith.addi %0, %arg1 : i32
    %c128_i32 = arith.constant 128 : i32
    %2 = arith.muli %1, %c128_i32 : i32
    %c0_i32 = arith.constant 0 : i32
    %3 = arith.cmpi eq, %arg1, %c0_i32 : i32
    %4 = arith.extui %3 : i1 to i32
    %c0_i32_0 = arith.constant 0 : i32
    %5 = arith.cmpi ne, %4, %c0_i32_0 : i32
    scf.if %5 {
      %cst_37 = arith.constant -1.000000e+30 : f32
      %68 = vector.broadcast %cst_37 : f32 to vector<1x1xf32>
      %c0_38 = arith.constant 0 : index
      %c0_39 = arith.constant 0 : index
      %c0_40 = arith.constant 0 : index
      %69 = vector.load %arg8[%c0_38, %c0_39, %c0_40] : memref<1x1x1xf32, #tpu.memory_space<vmem>>, vector<1x1x1xf32>
      %70 = vector.shape_cast %69 : vector<1x1x1xf32> to vector<1x1xf32>
      %71 = vector.shape_cast %68 : vector<1x1xf32> to vector<1x1x1xf32>
      tpu.vector_store %arg8[%c0_38, %c0_39, %c0_40], %71 {strides = array<i32>} : memref<1x1x1xf32, #tpu.memory_space<vmem>>, vector<1x1x1xf32>,
      %cst_41 = arith.constant 0.000000e+00 : f32
      %72 = vector.broadcast %cst_41 : f32 to vector<1x1xf32>
      %c0_42 = arith.constant 0 : index
      %c0_43 = arith.constant 0 : index
      %c0_44 = arith.constant 0 : index
      %73 = vector.load %arg9[%c0_42, %c0_43, %c0_44] : memref<1x1x1xf32, #tpu.memory_space<vmem>>, vector<1x1x1xf32>
      %74 = vector.shape_cast %73 : vector<1x1x1xf32> to vector<1x1xf32>
      %75 = vector.shape_cast %72 : vector<1x1xf32> to vector<1x1x1xf32>
      tpu.vector_store %arg9[%c0_42, %c0_43, %c0_44], %75 {strides = array<i32>} : memref<1x1x1xf32, #tpu.memory_space<vmem>>, vector<1x1x1xf32>,
      %cst_45 = arith.constant 0.000000e+00 : f32
      %76 = vector.broadcast %cst_45 : f32 to vector<1x512xf32>
      %c0_46 = arith.constant 0 : index
      %c0_47 = arith.constant 0 : index
      %c0_48 = arith.constant 0 : index
      %77 = vector.load %arg10[%c0_46, %c0_47, %c0_48] : memref<1x1x512xf32, #tpu.memory_space<vmem>>, vector<1x1x512xf32>
      %78 = vector.shape_cast %77 : vector<1x1x512xf32> to vector<1x512xf32>
      %79 = vector.shape_cast %76 : vector<1x512xf32> to vector<1x1x512xf32>
      tpu.vector_store %arg10[%c0_46, %c0_47, %c0_48], %79 {strides = array<i32>} : memref<1x1x512xf32, #tpu.memory_space<vmem>>, vector<1x1x512xf32>,
    } else {
    }
    %6 = tpu.iota {dimensions = array<i32: 0>} : vector<128x1xi32>
    %7 = vector.broadcast %2 : i32 to vector<128x1xi32>
    %8 = arith.addi %7, %6 : vector<128x1xi32>
    %c300_i32 = arith.constant 300 : i32
    %9 = vector.broadcast %c300_i32 : i32 to vector<128x1xi32>
    %10 = arith.cmpi slt, %8, %9 : vector<128x1xi32>
    %c0 = arith.constant 0 : index
    %c0_1 = arith.constant 0 : index
    %11 = vector.load %arg2[%c0, %c0_1] : memref<128x512xbf16, #tpu.memory_space<vmem>>, vector<128x512xbf16>
    %cst = arith.constant 0.000000e+00 : bf16
    %12 = vector.shape_cast %10 : vector<128x1xi1> to vector<128x1xi1>
    %13 = vector.broadcast %12 : vector<128x1xi1> to vector<128x512xi1>
    %14 = vector.broadcast %cst : bf16 to vector<128x512xbf16>
    %15 = arith.select %13, %11, %14 : vector<128x512xi1>, vector<128x512xbf16>
    %c0_2 = arith.constant 0 : index
    %c0_3 = arith.constant 0 : index
    %16 = vector.load %arg3[%c0_2, %c0_3] : memref<512x128xbf16, #tpu.memory_space<vmem>>, vector<512x128xbf16>
    %cst_4 = arith.constant dense<0.000000e+00> : vector<128x128xf32>
    %17 = tpu.matmul %15, %16, %cst_4 {dimension_numbers = #tpu.dot_dimension_numbers<[1], [0], [0], [1], [0, 0, 1, 1], [], []>} : vector<128x512xbf16>, vector<512x128xbf16>, vector<128x128xf32> -> vector<128x128xf32>
    %c0_5 = arith.constant 0 : index
    %c0_6 = arith.constant 0 : index
    %18 = vector.load %arg4[%c0_5, %c0_6] : memref<1x128xf32, #tpu.memory_space<vmem>>, vector<1x128xf32>
    %19 = vector.broadcast %18 : vector<1x128xf32> to vector<128x128xf32>
    %20 = arith.addf %17, %19 : vector<128x128xf32>
    %21 = arith.truncf %20 : vector<128x128xf32> to vector<128x128xbf16>
    %22 = math.tanh %21 : vector<128x128xbf16>
    %c0_7 = arith.constant 0 : index
    %c0_8 = arith.constant 0 : index
    %23 = vector.load %arg5[%c0_7, %c0_8] : memref<1x128xbf16, #tpu.memory_space<vmem>>, vector<1x128xbf16>
    %cst_9 = arith.constant dense<0.000000e+00> : vector<1x128xf32>
    %24 = tpu.matmul %23, %22, %cst_9 {dimension_numbers = #tpu.dot_dimension_numbers<[1], [1], [0], [0], [0, 0, 1, 0], [], []>} : vector<1x128xbf16>, vector<128x128xbf16>, vector<1x128xf32> -> vector<1x128xf32>
    %c0_10 = arith.constant 0 : index
    %c0_11 = arith.constant 0 : index
    %25 = vector.load %arg6[%c0_10, %c0_11] : memref<1x1xf32, #tpu.memory_space<vmem>>, vector<1x1xf32>
    %26 = vector.broadcast %25 : vector<1x1xf32> to vector<1x128xf32>
    %27 = arith.addf %24, %26 : vector<1x128xf32>
    %28 = tpu.iota {dimensions = array<i32: 1>} : vector<1x128xi32>
    %29 = vector.broadcast %2 : i32 to vector<1x128xi32>
    %30 = arith.addi %29, %28 : vector<1x128xi32>
    %c300_i32_12 = arith.constant 300 : i32
    %31 = vector.broadcast %c300_i32_12 : i32 to vector<1x128xi32>
    %32 = arith.cmpi slt, %30, %31 : vector<1x128xi32>
    %cst_13 = arith.constant -1.000000e+30 : f32
    %33 = vector.broadcast %cst_13 : f32 to vector<1x128xf32>
    %34 = arith.select %32, %27, %33 : vector<1x128xi1>, vector<1x128xf32>
    %c0_14 = arith.constant 0 : index
    %c0_15 = arith.constant 0 : index
    %35 = vector.load %arg7[%c0_14, %c0_15] : memref<1x128xf32, #tpu.memory_space<vmem>>, vector<1x128xf32>
    tpu.vector_store %arg7[%c0_14, %c0_15], %34 {strides = array<i32>} : memref<1x128xf32, #tpu.memory_space<vmem>>, vector<1x128xf32>,
    %c0_16 = arith.constant 0 : index
    %c0_17 = arith.constant 0 : index
    %c0_18 = arith.constant 0 : index
    %36 = vector.load %arg8[%c0_16, %c0_17, %c0_18] : memref<1x1x1xf32, #tpu.memory_space<vmem>>, vector<1x1x1xf32>
    %37 = vector.shape_cast %36 : vector<1x1x1xf32> to vector<1x1xf32>
    %cst_19 = arith.constant dense<0xFF800000> : vector<1xf32>
    %38 = vector.multi_reduction <maximumf>, %34, %cst_19 [1] : vector<1x128xf32> to vector<1xf32>
    %39 = vector.shape_cast %38 : vector<1xf32> to vector<1x1xf32>
    %40 = arith.maximumf %37, %39 : vector<1x1xf32>
    %41 = arith.subf %37, %40 : vector<1x1xf32>
    %42 = math.exp %41 : vector<1x1xf32>
    %43 = vector.broadcast %40 : vector<1x1xf32> to vector<1x128xf32>
    %44 = arith.subf %34, %43 : vector<1x128xf32>
    %45 = math.exp %44 : vector<1x128xf32>
    %c0_20 = arith.constant 0 : index
    %c0_21 = arith.constant 0 : index
    %c0_22 = arith.constant 0 : index
    %46 = vector.load %arg9[%c0_20, %c0_21, %c0_22] : memref<1x1x1xf32, #tpu.memory_space<vmem>>, vector<1x1x1xf32>
    %47 = vector.shape_cast %46 : vector<1x1x1xf32> to vector<1x1xf32>
    %48 = arith.mulf %42, %47 : vector<1x1xf32>
    %cst_23 = arith.constant dense<0.000000e+00> : vector<1xf32>
    %49 = vector.multi_reduction <add>, %45, %cst_23 [1] : vector<1x128xf32> to vector<1xf32>
    %50 = vector.shape_cast %49 : vector<1xf32> to vector<1x1xf32>
    %51 = arith.addf %48, %50 : vector<1x1xf32>
    %c0_24 = arith.constant 0 : index
    %c0_25 = arith.constant 0 : index
    %c0_26 = arith.constant 0 : index
    %52 = vector.load %arg9[%c0_24, %c0_25, %c0_26] : memref<1x1x1xf32, #tpu.memory_space<vmem>>, vector<1x1x1xf32>
    %53 = vector.shape_cast %52 : vector<1x1x1xf32> to vector<1x1xf32>
    %54 = vector.shape_cast %51 : vector<1x1xf32> to vector<1x1x1xf32>
    tpu.vector_store %arg9[%c0_24, %c0_25, %c0_26], %54 {strides = array<i32>} : memref<1x1x1xf32, #tpu.memory_space<vmem>>, vector<1x1x1xf32>,
    %c0_27 = arith.constant 0 : index
    %c0_28 = arith.constant 0 : index
    %c0_29 = arith.constant 0 : index
    %55 = vector.load %arg10[%c0_27, %c0_28, %c0_29] : memref<1x1x512xf32, #tpu.memory_space<vmem>>, vector<1x1x512xf32>
    %56 = vector.shape_cast %55 : vector<1x1x512xf32> to vector<1x512xf32>
    %57 = vector.broadcast %42 : vector<1x1xf32> to vector<1x512xf32>
    %58 = arith.mulf %57, %56 : vector<1x512xf32>
    %59 = arith.truncf %45 : vector<1x128xf32> to vector<1x128xbf16>
    %cst_30 = arith.constant dense<0.000000e+00> : vector<1x512xf32>
    %60 = tpu.matmul %59, %15, %cst_30 {dimension_numbers = #tpu.dot_dimension_numbers<[1], [0], [0], [1], [0, 0, 1, 1], [], []>} : vector<1x128xbf16>, vector<128x512xbf16>, vector<1x512xf32> -> vector<1x512xf32>
    %61 = arith.addf %58, %60 : vector<1x512xf32>
    %c0_31 = arith.constant 0 : index
    %c0_32 = arith.constant 0 : index
    %c0_33 = arith.constant 0 : index
    %62 = vector.load %arg10[%c0_31, %c0_32, %c0_33] : memref<1x1x512xf32, #tpu.memory_space<vmem>>, vector<1x1x512xf32>
    %63 = vector.shape_cast %62 : vector<1x1x512xf32> to vector<1x512xf32>
    %64 = vector.shape_cast %61 : vector<1x512xf32> to vector<1x1x512xf32>
    tpu.vector_store %arg10[%c0_31, %c0_32, %c0_33], %64 {strides = array<i32>} : memref<1x1x512xf32, #tpu.memory_space<vmem>>, vector<1x1x512xf32>,
    %c0_34 = arith.constant 0 : index
    %c0_35 = arith.constant 0 : index
    %c0_36 = arith.constant 0 : index
    %65 = vector.load %arg8[%c0_34, %c0_35, %c0_36] : memref<1x1x1xf32, #tpu.memory_space<vmem>>, vector<1x1x1xf32>
    %66 = vector.shape_cast %65 : vector<1x1x1xf32> to vector<1x1xf32>
    %67 = vector.shape_cast %40 : vector<1x1xf32> to vector<1x1x1xf32>
    tpu.vector_store %arg8[%c0_34, %c0_35, %c0_36], %67 {strides = array<i32>} : memref<1x1x1xf32, #tpu.memory_space<vmem>>, vector<1x1x1xf32>,
    return
  }
  func.func @transform_0(%arg0: i32, %arg1: i32) -> (i32, i32) {
    %c2_i32 = arith.constant 2 : i32
    %0 = arith.muli %arg0, %c2_i32 : i32
    %1 = arith.addi %0, %arg1 : i32
    %c2_i32_0 = arith.constant 2 : i32
    %2 = arith.minsi %1, %c2_i32_0 : i32
    %c0_i32 = arith.constant 0 : i32
    %c0_i32_1 = arith.constant 0 : i32
    return %2, %c0_i32 : i32, i32
  }
  func.func @transform_1(%arg0: i32, %arg1: i32) -> (i32, i32) {
    %c0_i32 = arith.constant 0 : i32
    %c0_i32_0 = arith.constant 0 : i32
    %c0_i32_1 = arith.constant 0 : i32
    return %c0_i32, %c0_i32_0 : i32, i32
  }
  func.func @transform_2(%arg0: i32, %arg1: i32) -> (i32, i32) {
    %c0_i32 = arith.constant 0 : i32
    %c0_i32_0 = arith.constant 0 : i32
    %c0_i32_1 = arith.constant 0 : i32
    return %c0_i32, %c0_i32_0 : i32, i32
  }
  func.func @transform_3(%arg0: i32, %arg1: i32) -> (i32, i32) {
    %c0_i32 = arith.constant 0 : i32
    %c0_i32_0 = arith.constant 0 : i32
    %c0_i32_1 = arith.constant 0 : i32
    return %c0_i32, %c0_i32_0 : i32, i32
  }
  func.func @transform_4(%arg0: i32, %arg1: i32) -> (i32, i32) {
    %c0_i32 = arith.constant 0 : i32
    %c0_i32_0 = arith.constant 0 : i32
    %c0_i32_1 = arith.constant 0 : i32
    return %c0_i32, %c0_i32_0 : i32, i32
  }
  func.func @transform_5(%arg0: i32, %arg1: i32) -> (i32, i32) {
    %c2_i32 = arith.constant 2 : i32
    %0 = arith.muli %arg0, %c2_i32 : i32
    %1 = arith.addi %0, %arg1 : i32
    %c0_i32 = arith.constant 0 : i32
    %c0_i32_0 = arith.constant 0 : i32
    return %c0_i32, %1 : i32, i32
  }
  func.func @transform_6(%arg0: i32, %arg1: i32) -> (i32, i32, i32) {
    %c0_i32 = arith.constant 0 : i32
    %c0_i32_0 = arith.constant 0 : i32
    %c0_i32_1 = arith.constant 0 : i32
    return %arg0, %c0_i32, %c0_i32_0 : i32, i32, i32
  }
  func.func @transform_7(%arg0: i32, %arg1: i32) -> (i32, i32, i32) {
    %c0_i32 = arith.constant 0 : i32
    %c0_i32_0 = arith.constant 0 : i32
    %c0_i32_1 = arith.constant 0 : i32
    return %arg0, %c0_i32, %c0_i32_0 : i32, i32, i32
  }
  func.func @transform_8(%arg0: i32, %arg1: i32) -> (i32, i32, i32) {
    %c0_i32 = arith.constant 0 : i32
    %c0_i32_0 = arith.constant 0 : i32
    %c0_i32_1 = arith.constant 0 : i32
    return %arg0, %c0_i32, %c0_i32_0 : i32, i32, i32
  }
}

</mosaic_0001>

<bundles_post_ra>
// kernel: tpu_custom_call.1
= control target key start
LH: loop header
LB: loop body
LE: loop exit
PB: predicated region body
PF: predicated region fallthrough
CT: control target
= control target key end

     0   :  { %s3125_s0 = inlined_call_operand.hbm [shape: bf16[300,512], index: 0, kind: input, shape index: {}]   ;;  %s3126_s1 = inlined_call_operand.hbm [shape: bf16[512,128], index: 1, kind: input, shape index: {}]   ;;  %s3127_s2 = inlined_call_operand.vmem [shape: f32[1,128], index: 2, kind: input, shape index: {}]   ;;  %s3128_s3 = inlined_call_operand.vmem [shape: bf16[1,128], index: 3, kind: input, shape index: {}]   ;;  %s3129_s4 = inlined_call_operand.<no memory space> [shape: f32[1,1], index: 4, kind: input, shape index: {}]   ;;  %s3130_s5 = inlined_call_operand.hbm [shape: f32[1,512], index: 5, kind: output, shape index: {0}]   ;;  %s3131_s6 = inlined_call_operand.vmem [shape: f32[2,1,1], index: 6, kind: output, shape index: {1}]   ;;  %s3132_s7 = inlined_call_operand.vmem [shape: f32[2,1,1], index: 7, kind: output, shape index: {2}]   ;;  %s3133_s8 = inlined_call_operand.hbm [shape: f32[2,1,512], index: 8, kind: output, shape index: {3}]  }
   0x1   :  { %3163 = sst [smem:[#allocation35_spill]] %s3127_s2  ;;  %v14_v0 = vstv %s3129_s4 }
   0x2   :  { %3164 = sst [smem:[#allocation36_spill]] %s3128_s3  ;;  %15 = vst [vmem:[#allocation2] sm:$0x1] %v14_v0 }
   0x3   :  { %3165 = sst [smem:[#allocation37_spill]] %s3130_s5 }
   0x4   :  { %3166 = sst [smem:[#allocation38_spill]] %s3132_s7 }
   0x5   :  { %3167 = sst [smem:[#allocation39_spill]] %s3133_s8 }
   0x6   :  { %16 = vsyncpa [#allocation4], 0 }
   0x7   :  { %18 = vsyncpa [#allocation4 + $0x1], 0 }
   0x8   :  { %19 = vsyncpa [#allocation7], 0 }
   0x9   :  { %20 = vsyncpa [#allocation5], 0 }
   0xa   :  { %22 = vsyncpa [#allocation5 + $0x1], 0 }
   0xb   :  { %23 = vsyncpa [#allocation10], 0 }
   0xc   :  { %25 = vsyncpa [#allocation10 + $0x1], 0  ;;  %s2400_s29 = smov 0   ;;  %s2402_s30 = smov 0  }
   0xd   :  { %s2404_s9 = smov 0   ;;  %s2406_s10 = smov 0  }
   0xe   :  { %s2408_s11 = smov 0   ;;  %s2410_s12 = smov 0  }
   0xf   :  { %s2412_s4 = smov 0   ;;  %s2414_s13 = smov 0  }
  0x10   :  { %s2416_s14 = smov 0   ;;  %s2418_s15 = smov 0  }
  0x11   :  { %s2420_s16 = smov 0   ;;  %s2422_s17 = smov 0  }
  0x12   :  { %s2424_s18 = smov 0   ;;  %s2426_s19 = smov 0  }
  0x13 LB: > { %3168 = sst [smem:[#allocation15_spill]] %s2292_s9  ;;  %s1647_s20 = sadd.s32 4294967295, %s2336_s19   ;;  %s2336_s19 = sphi %s2426_s19, %s31_s19   ;;  %s2332_s18 = sphi %s2424_s18, %s3270_s18   ;;  %s2328_s17 = sphi %s2422_s17, %s3269_s17   ;;  %s2324_s16 = sphi %s2420_s16, %s3256_s16   ;;  %s2320_s15 = sphi %s2418_s15, %s3268_s15   ;;  %s2316_s14 = sphi %s2416_s14, %s3267_s14   ;;  %s2312_s13 = sphi %s2414_s13, %s3266_s13   ;;  %s2308_s4 = sphi %s2412_s4, %s3265_s4   ;;  %s2304_s12 = sphi %s2410_s12, %s3253_s12   ;;  %s2300_s11 = sphi %s2408_s11, %s3264_s11   ;;  %s2296_s10 = sphi %s2406_s10, %s3263_s10   ;;  %s2292_s9 = sphi %s2404_s9, %s3262_s9   ;;  %s2288_s30 = sphi %s2402_s30, %s3261_s30   ;;  %s2284_s29 = sphi %s2400_s29, %s3260_s29  }
  0x14   : > { %3169 = sst [smem:[#allocation16_spill]] %s2296_s10  ;;  %s40_s22 = sadd.s32 1, %s2328_s17 }
  0x15   : > { %3170 = sst [smem:[#allocation17_spill]] %s2304_s12  ;;  %s43_s23 = sadd.s32 1, %s2332_s18 }
  0x16   : > { %3171 = sst [smem:[#allocation18_spill]] %s2328_s17  ;;  %p41_p0 = scmp.ge.s32.totalorder %s40_s22, 2 }
  0x17   : > { %3172 = sst [smem:[#allocation19_spill]] %s2332_s18  ;;  %s1649_s24 = sshll.u32 %s2332_s18, 1 }
  0x18   : > { %s48_s25 = sadd.s32 %s2328_s17, %s1649_s24  ;;  %s58_s26 = sadd.s32 1, %s2316_s14 }
  0x19   : > { %s3272_s22 = smov (%p41_p0, %s40_s22), 0  ;;  %s3274_s23 = smov (!%p41_p0, %s43_s23), %s2332_s18 }
  0x1a   : > { %3173 = sst [smem:[#allocation20_spill]] %s3272_s22  ;;  %p49_p1 = scmp.lt.s32.totalorder %s48_s25, 2 }
  0x1b   : > { %p65_p2 = scmp.ne.s32.totalorder %s2316_s14, %s2312_s13  ;;  %p45_p3 = scmp.ge.s32.totalorder %s3274_s23, 2 }
  0x1c   : > { %p66_p4 = scmp.eq.s32.totalorder %s2336_s19, 0  ;;  %p71_p6 = scmp.ne.s32.totalorder %s2312_s13, %s2308_s4 }
  0x1d   : > { %s2483_s27 = scalar_select %p49_p1, %s48_s25, 2 }
  0x1e   : > { %s3276_s23 = smov (%p45_p3, %s3274_s23), 0  ;;  %p2487_p5 = por %p66_p4, %p65_p2 }
  0x1f   : > { %3174 = sst [smem:[#allocation21_spill]] %s3276_s23  ;;  %s1650_s24 = sshll.u32 %s3276_s23, 1 }
  0x20   : > { %p2494_p7 = scmp.eq.s32.totalorder %s1647_s20, 0  ;;  %s52_s17 = sadd.s32 %s1650_s24, %s3272_s22 }
  0x21   : > { %s172_s8 = sadd.s32 1, %s2304_s12  ;;  %p53_p8 = scmp.lt.s32.totalorder %s52_s17, 2 }
  0x22   : > { %p2502_p9 = por %p2494_p7, %p71_p6  ;;  %s169_s4 = ssub.s32 %s48_s25, %s52_s17 }
  0x23   : > { %p182_p10 = scmp.ne.s32.totalorder %s2304_s12, %s2300_s11  ;;  %s3278_s17 = smov (!%p53_p8, %s52_s17), 2 }
  0x24   : > { %s3177_s5 = scalar_select %p2502_p9, 1, 0 }
  0x25   : > { %p170_p11 = scmp.eq.s32.totalorder %s169_s4, 0  ;;  %p2508_p12 = scmp.eq.s32.totalorder %s1647_s20, 3 }
  0x26   : > { %s55_s22 = ssub.s32 %s2483_s27, %s3278_s17  ;;  %p188_p13 = scmp.ne.s32.totalorder %s2300_s11, %s2296_s10 }
  0x27   : > { %p56_p0 = scmp.eq.s32.totalorder %s55_s22, 0  ;;  %p2517_p1 = por %p2508_p12, %p182_p10 }
  0x28   : > { %s2522_s3 = scalar_select %p170_p11, %s2304_s12, %s172_s8  }
  0x29   : > { %s3179_s25 = scalar_select %p2517_p1, 1, 0 }
  0x2a   : > { %3180 = sst [smem:[#allocation22_spill]] %s2522_s3  ;;  %s3182_s20 = sadd.s32 4294967294, %s2336_s19  }
  0x2b   : > { %s2525_s4 = scalar_select %p56_p0, %s2316_s14, %s58_s26  }
  0x2c   : > { %p189_p2 = scmp.eq.s32.totalorder %s3182_s20, 3  ;;  %s247_s2 = ssub.s32 %s2332_s18, %s3276_s23 }
  0x2d   : > { %3181 = sst [smem:[#allocation23_spill]] %s2525_s4  ;;  %p248_p3 = scmp.eq.s32.totalorder %s247_s2, 0 }
  0x2e   : > { %s250_s7 = sadd.s32 1, %s2292_s9  ;;  %p2532_p4 = por %p189_p2, %p188_p13 }
  0x2f   : > { %p260_p6 = scmp.ne.s32.totalorder %s2292_s9, %s2288_s30  ;;  %p266_p10 = scmp.ne.s32.totalorder %s2288_s30, %s2284_s29 }
  0x30   : > { %s3183_s17 = scalar_select %p2532_p4, 1, 0 }
  0x31   : > { %s2539_s22 = scalar_select %p248_p3, %s2292_s9, %s250_s7  }
  0x32   : > { %p2543_p8 = por %p260_p6, %p2508_p12  ;;  %p1653_p11 = scmp.ge.s32.totalorder %s2336_s19, 1 }
  0x33   : > { %3184 = sst [smem:[#allocation24_spill]] %s2539_s22  ;;  %p274_p0 = scmp.lt.s32.totalorder %s2336_s19, 5 }
  0x34   : > { %s3185_s10 = scalar_select %p2543_p8, 1, 0 }
  0x35   : > { %p2551_p1 = por %p266_p10, %p189_p2  ;;  %p2555_p9 = pnand %p1653_p11, %p274_p0 }
  0x36   : > { %s2338_s26 = smov [#allocation6]  }
  0x37   : > { %s3186_s8 = scalar_select %p2551_p1, 1, 0 }
  0x38   : > { %s286_s7 = sshll.u32 %s2338_s26, 4  ;;  %p1915_p13 = pneg %p2555_p9  ;;  %s287_s7 = int_to_ptr.vmem [resolvable:$true] %s286_s7 }
  0x39   : > { %s2117_s24 = scalar_lea.vmem %s287_s7, 4096  ;;  %p2125_p10 = scmp.lt.s32.totalorder %s287_s7, %s287_s7 }
  0x3a   : > { %p1916_p12 = pnand %p1915_p13, %p2494_p7  ;;  %p2118_p6 = scmp.ne.s32.totalorder %s287_s7, %s2117_s24 }
  0x3b   : > { %p2126_p8 = scmp.lt.s32.totalorder %s2117_s24, %s2117_s24 }
  0x3c   : > { %p2108_p3 = pneg %p1916_p12 }
  0x3d   : > { %p2127_p1 = por %p2126_p8, %p2125_p10 }
  0x3e   : > { %p2120_p4 = pnand %p2118_p6, %p2108_p3 }
  0x40   : > { %p2121_p2 = pneg %p2120_p4 }
  0x42   : > { %p2128_p11 = pnand %p2127_p1, %p2121_p2 }
  0x44   : > { %2131 = shalt.err (!%p2128_p11)
}
  0x45   : > { %s2339_s20 = smov 64   ;;  %s2340_s23 = smov 4  }
  0x46   : > { %1918 = dma.hbm_to_vmem [thread:$0]  (!%p1916_p12), %s3126_s1, 4096, %s287_s7, [#allocation7], %s2339_s20, %s2339_s20, %s2340_s23  }
  0x47   : > { %p1655_p0 = scmp.ge.s32.totalorder %s2336_s19, 4 }
  0x49   : > { %305 = sbr.rel (%p1655_p0) target bundleno = 110 (0x6e), region = 32 }
  0x4e   : > { %308 = sbr.rel (!%p2487_p5) target bundleno = 110 (0x6e), region = 36  ;;  %s309_s26 = sand.u32 (%p2487_p5), 1, %s2316_s14  }
  0x4f   : > { %s1658_s3 = sshll.u32 (%p2487_p5), %s2483_s27, 4  ;;  %s1656_s24 = sshll.u32 (%p2487_p5), %s309_s26, 8 }
  0x50   : > { %s319_s12 = ssub.s32 (%p2487_p5), 38, %s1658_s3  ;;  %s2574_s18 = scalar_lea.sflag (%p2487_p5), [#allocation4], %s309_s26 }
  0x51   : > { %p320_p1 = scmp.lt.s32.totalorder (%p2487_p5), %s319_s12, 16  ;;  %s313_s23 = scalar_lea.vmem (%p2487_p5), [#allocation3], %s1656_s24 }
  0x53   : > { %s3280_s12 = smov (!%p320_p1, %s319_s12), 16 }
  0x54   : > { %s2571_s22 = sshll.u32 %s3280_s12, 8 }
  0x55   : > { %s325_s9 = ssub.s32 4096, %s2571_s22 }
  0x56   : > { %326 = vsyncadd %s2574_s18, %s325_s9  ;;  %p1661_p5 = scmp.ne.s32.totalorder %s2571_s22, 0  ;;  %s1747_s28 = sshll.u32 %s2483_s27, 12 }
  0x57   : > { %s2582_s3 = scalar_lea.hbm %s3125_s0, %s1747_s28  ;;  %s332_s12 = sshll.u32 %s313_s23, 4  ;;  %s2584_s12 = int_to_ptr.vmem [resolvable:$true] %s332_s12 }
  0x58   : > { %s2132_s20 = scalar_lea.hbm %s2582_s3, %s2571_s22  ;;  %s2136_s24 = scalar_lea.hbm %s3125_s0, 9728 }
  0x59   : > { %p2133_p4 = scmp.ne.s32.totalorder %s2582_s3, %s2132_s20  ;;  %p2138_p12 = scmp.lt.s32.totalorder %s2136_s24, %s2132_s20 }
  0x5b   : > { %p2134_p8 = pnand %p2133_p4, %p1661_p5 }
  0x5d   : > { %p2135_p13 = pneg %p2134_p8 }
  0x5f   : > { %p2140_p3 = pnand %p2138_p12, %p2135_p13 }
  0x61   : > { %2143 = shalt.err (!%p2140_p3)
}
  0x62   : > { %s2144_s27 = scalar_lea.vmem %s2584_s12, %s2571_s22  ;;  %s2341_s23 = smov [#allocation3]  }
  0x63   : > { %p2145_p6 = scmp.ne.s32.totalorder %s2584_s12, %s2144_s27  ;;  %s2148_s28 = sshll.u32 %s2341_s23, 4  ;;  %s2149_s28 = int_to_ptr.vmem [resolvable:$false] %s2148_s28 }
  0x64   : > { %s2150_s4 = scalar_lea.vmem %s2149_s28, 8192  ;;  %p2151_p11 = scmp.lt.s32.totalorder %s2584_s12, %s2149_s28 }
  0x65   : > { %p2146_p2 = pnand %p2145_p6, %p1661_p5  ;;  %p2152_p0 = scmp.lt.s32.totalorder %s2150_s4, %s2144_s27 }
  0x67   : > { %p2147_p10 = pneg %p2146_p2  ;;  %p2153_p1 = por %p2152_p0, %p2151_p11 }
  0x69   : > { %p2154_p4 = pnand %p2153_p1, %p2147_p10 }
  0x6b   : > { %2157 = shalt.err (!%p2154_p4)
}
  0x6c   : > { %s2342_s7 = smov 256   ;;  %s2343_s20 = smov 16  }
  0x6d   : > { %338 = dma.hbm_to_vmem [thread:$0]  (%p1661_p5), %s2582_s3, %s2571_s22, %s2584_s12, %s2574_s18, %s2342_s7, %s2342_s7, %s2343_s20  }
  0x6e PF: > { %344 = sbr.rel (%p2555_p9) target bundleno = 1214 (0x4be), region = 40 }
  0x73   : > { %s346_s9 = sand.u32 1, %s2312_s13   ;;  %p3188_p8 = scmp.ne.s32.totalorder %s3177_s5, 0 }
  0x74   : > { %s1667_s26 = sshll.u32 %s346_s9, 8  ;;  %s347_s24 = scalar_lea.sflag [#allocation4], %s346_s9 }
  0x75   : > { %s2609_s27 = scalar_lea.vmem [#allocation3], %s1667_s26 }
  0x76   : > { %2267 = dma.done.wait (%p3188_p8), %s347_s24, 4096  }
  0x77   : > { %2269 = vsyncadd (%p3188_p8), %s347_s24, 4294963200 }
  0x78   : > { %2271 = dma.done.wait (%p2494_p7), [#allocation7], 4096  }
  0x79   : > { %2273 = vsyncadd (%p2494_p7), [#allocation7], 4294963200  ;;  %s378_s22 = sand.u32 1, %s2300_s11   ;;  %s3146_s2 = sand.u32 1, %s2288_s30  }
  0x7a   : > { %s1669_s18 = sshll.u32 %s3146_s2, 2  ;;  %p409_p9 = scmp.lt.s32.totalorder %s2324_s16, 1 }
  0x7b   : > { %s1670_s5 = sshll.u32 %s2324_s16, 1  ;;  %s3189_s20 = sld [smem:[#allocation38_spill]] }
  0x7c   : > { %s410_s3 = scalar_select %p409_p9, %s2324_s16, 1 }
  0x7d   : > { %s2627_s12 = sadd.s32 %s2320_s15, %s1670_s5  ;;  %s2642_s24 = scalar_lea.vmem [#allocation8], %s378_s22 }
  0x7e   : > { %s2632_s28 = scalar_lea.vmem %s3131_s6, %s410_s3  ;;  %s1671_s26 = sshll.u32 %s2627_s12, 7 }
  0x7f   : > { %s2644_s2 = scalar_lea.vmem [#allocation9], %s1669_s18  ;;  %p1672_p7 = scmp.ne.s32.totalorder %s2320_s15, 0 }
  0x81   : > { %s2637_s9 = scalar_lea.vmem %s3189_s20, %s410_s3  ;;  %422 = sbr.rel (%p1672_p7) target bundleno = 138 (0x8a), region = 52 }
  0x86   : > { %vm423_vm0 = vcmask 0   ;;  %v426_v1 = vlaneseq  ;;  %v2344_v2 = vmov -1e+30   ;;  %v2345_v3 = vmov 0.0  }
  0x87   : > { %424 = vst.msk [vmem:[%s2632_s28] sm:$0x1] %vm423_vm0, %v2344_v2  ;;  %425 = vst.msk [vmem:[%s2637_s9] sm:$0x1] %vm423_vm0, %v2345_v3 }
  0x88   : > { %vm428_vm1 = vcmp.lt.s32.totalorder %v426_v1, 512 }
  0x89   : > { %430 = vst.msk [vmem:[%s2644_s2] sm:$0xf] %vm428_vm1, %v2345_v3 }
  0x8a PF: > { %v2054_v4 = vld [vmem:[#allocation6 + $0x78] sm:$0xff]   ;;  %v2058_v8 = vld [vmem:[#allocation6 + $0x70] sm:$0xff]   ;;  %v2062_v12 = vld [vmem:[#allocation6 + $0x68] sm:$0xff]   ;;  %v3147_v18 = vlaneseq  ;;  %v2656_v30 = vstv %s1671_s26  ;;  %s3222_s18 = sld [smem:[#allocation35_spill]]  ;;  %s1740_s21 = sshll.u32 %s2627_s12, 4 }
  0x8b   : > { %v2055_v5 = vld [vmem:[#allocation6 + $0xf8] sm:$0xff]   ;;  %1749 = vmatprep.subr.bf16.mxu0 %v2054_v4  ;;  %v2059_v9 = vld [vmem:[#allocation6 + $0xf0] sm:$0xff]   ;;  %v2063_v13 = vld [vmem:[#allocation6 + $0xe8] sm:$0xff]   ;;  %3191 = vst [vmem:[#allocation26_spill] sm:$0xff] %v2656_v30  ;;  %s3228_s23 = sld [smem:[#allocation36_spill]]  ;;  %s1468_s26 = sshll.u32 %s2642_s24, 4  ;;  %s1469_s26 = int_to_ptr.vmem [resolvable:$true] %s1468_s26 }
  0x8c   : > { %v2056_v6 = vld [vmem:[#allocation6 + $0x38] sm:$0xff]   ;;  %1813 = vmatprep.subr.bf16.mxu1 %v2055_v5  ;;  %v2060_v10 = vld [vmem:[#allocation6 + $0x30] sm:$0xff]   ;;  %v2064_v14 = vld [vmem:[#allocation6 + $0x28] sm:$0xff]   ;;  %v2651_v23 = vshrl.u32 %v3147_v18, 7  ;;  %s3241_s7 = sld [smem:[#allocation37_spill]]  ;;  %s1443_s15 = scalar_lea.sflag [#allocation5], %s378_s22 }
  0x8d   : > { %v2057_v7 = vld [vmem:[#allocation6 + $0xb8] sm:$0xff]   ;;  %1750 = vmatpush3.bf16.msra.mxu0 %v2056_v6  ;;  %v2061_v11 = vld [vmem:[#allocation6 + $0xb0] sm:$0xff]   ;;  %v2065_v15 = vld [vmem:[#allocation6 + $0xa8] sm:$0xff]   ;;  %p3242_p13 = scmp.ne.s32.totalorder %s3179_s25, 0 }
  0x8e   : > { %1814 = vmatpush3.bf16.msra.mxu1 %v2057_v7  ;;  %1751 = vmatprep.subr.bf16.mxu0 %v2058_v8  ;;  %v2066_v16 = vld [vmem:[#allocation6 + $0x60] sm:$0xff]   ;;  %v2070_v21 = vld [vmem:[#allocation6 + $0x58] sm:$0xff]   ;;  %3190 = vst [vmem:[#allocation25_spill] sm:$0xff] %v2651_v23  ;;  %v2074_v26 = vld [vmem:[#allocation6 + $0x50] sm:$0xff]   ;;  %v433_v28 = vadd.s32 8, %v2651_v23  ;;  %v434_v31 = vadd.s32 16, %v2651_v23  ;;  %v449_v37 = vadd.s32 %v2656_v30, %v2651_v23 }
  0x8f   : > { %1815 = vmatprep.subr.bf16.mxu1 %v2059_v9  ;;  %v2067_v17 = vld [vmem:[#allocation6 + $0xe0] sm:$0xff]   ;;  %v2071_v22 = vld [vmem:[#allocation6 + $0xd8] sm:$0xff]   ;;  %v2075_v27 = vld [vmem:[#allocation6 + $0xd0] sm:$0xff]   ;;  %v435_v33 = vadd.s32 24, %v2651_v23  ;;  %v436_v35 = vadd.s32 32, %v2651_v23  ;;  %v437_v38 = vadd.s32 40, %v2651_v23 }
  0x90   : > { %v2068_v19 = vld [vmem:[#allocation6 + $0x20] sm:$0xff]   ;;  %v2072_v24 = vld [vmem:[#allocation6 + $0x18] sm:$0xff]   ;;  %v2076_v29 = vld [vmem:[#allocation6 + $0x10] sm:$0xff]   ;;  %v450_v40 = vadd.s32 %v2656_v30, %v433_v28  ;;  %v451_v42 = vadd.s32 %v2656_v30, %v434_v31  ;;  %v438_v46 = vadd.s32 48, %v2651_v23  ;;  %vm465_vm2 = vcmp.lt.s32.totalorder %v449_v37, 300 }
  0x91   : > { %1752 = vmatpush3.bf16.msra.mxu0 %v2060_v10  ;;  %v2069_v20 = vld [vmem:[#allocation6 + $0xa0] sm:$0xff]   ;;  %v2073_v25 = vld [vmem:[#allocation6 + $0x98] sm:$0xff]   ;;  %v2077_v32 = vld [vmem:[#allocation6 + $0x90] sm:$0xff]   ;;  %v452_v44 = vadd.s32 %v2656_v30, %v435_v33  ;;  %v453_v45 = vadd.s32 %v2656_v30, %v436_v35  ;;  %v454_v48 = vadd.s32 %v2656_v30, %v437_v38  ;;  %v439_v53 = vadd.s32 56, %v2651_v23 }
  0x92   : > { %1816 = vmatpush3.bf16.msra.mxu1 %v2061_v11  ;;  %1753 = vmatprep.subr.bf16.mxu0 %v2062_v12  ;;  %v2078_v34 = vld [vmem:[#allocation6 + $0x48] sm:$0xff]   ;;  %v2082_v43 = vld [vmem:[#allocation6 + $0x40] sm:$0xff]   ;;  %vm466_vm3 = vcmp.lt.s32.totalorder %v450_v40, 300  ;;  %vm467_vm4 = vcmp.lt.s32.totalorder %v451_v42, 300  ;;  %v483_v52 = vld [vmem:[%s2609_s27 + $0x10] sm:$0xff]  ;;  %v2674_v54 = vadd.s32 %v2656_v30, %v438_v46  ;;  %v444_v58 = vadd.s32 96, %v2651_v23  ;;  %s1466_s20 = scalar_lea.hbm %s3241_s7, %s1740_s21 }
  0x93   : > { %1817 = vmatprep.subr.bf16.mxu1 %v2063_v13  ;;  %v2079_v36 = vld [vmem:[#allocation6 + $0xc8] sm:$0xff]   ;;  %v2083_v47 = vld [vmem:[#allocation6 + $0xc0] sm:$0xff]   ;;  %vm545_vm5 = vmpackc.low %vm465_vm2, %vm465_vm2  ;;  %vm468_vm6 = vcmp.lt.s32.totalorder %v452_v44, 300  ;;  %vm469_vm7 = vcmp.lt.s32.totalorder %v453_v45, 300  ;;  %vm470_vm9 = vcmp.lt.s32.totalorder %v454_v48, 300  ;;  %v445_v59 = vadd.s32 104, %v2651_v23 }
  0x94   : > { %v2080_v39 = vld [vmem:[#allocation6 + $0x8] sm:$0xff]   ;;  %v2084_v49 = vld [vmem:[#allocation6] sm:$0xff]   ;;  %vm546_vm8 = vmpackc.low %vm466_vm3, %vm466_vm3  ;;  %v446_v1 = vadd.s32 112, %v2651_v23  ;;  %vm471_vm14 = vcmp.lt.s32.totalorder %v2674_v54, 300  ;;  %v441_v35 = vadd.s32 72, %v2651_v23 }
  0x95   : > { %1754 = vmatpush3.bf16.msra.mxu0 %v2064_v14  ;;  %v2081_v41 = vld [vmem:[#allocation6 + $0x88] sm:$0xff]   ;;  %v2085_v50 = vld [vmem:[#allocation6 + $0x80] sm:$0xff]   ;;  %v484_v57 = vld [vmem:[%s2609_s27 + $0x18] sm:$0xff]  ;;  %v563_v60 = vsel %vm546_vm8, %v483_v52, 0 }
  0x96   : > { %1818 = vmatpush3.bf16.msra.mxu1 %v2065_v15  ;;  %1755 = vmatprep.subr.bf16.mxu0 %v2066_v16  ;;  %v481_v51 = vld [vmem:[%s2609_s27] sm:$0xff]  ;;  %v482_v56 = vld [vmem:[%s2609_s27 + $0x8] sm:$0xff]  ;;  %v564_v62 = vsel %vm546_vm8, %v484_v57, 0  ;;  %v487_v0 = vld [vmem:[%s2609_s27 + $0x30] sm:$0xff]  ;;  %v463_v28 = vadd.s32 %v2656_v30, %v446_v1 }
  0x97   : > { %1819 = vmatprep.subr.bf16.mxu1 %v2067_v17  ;;  %v561_v55 = vsel %vm545_vm5, %v481_v51, 0  ;;  %v562_v61 = vsel %vm545_vm5, %v482_v56, 0  ;;  %v485_v63 = vld [vmem:[%s2609_s27 + $0x20] sm:$0xff]  ;;  %vm547_vm10 = vmpackc.low %vm467_vm4, %vm467_vm4  ;;  %v486_v6 = vld [vmem:[%s2609_s27 + $0x28] sm:$0xff] }
  0x98   : > { %v2685_v2 = vcombine.low %v561_v55, %v563_v60  ;;  %v2687_v3 = vcombine.high %v561_v55, %v563_v60  ;;  %v2689_v4 = vcombine.low %v562_v61, %v564_v62  ;;  %v2691_v5 = vcombine.high %v562_v61, %v564_v62  ;;  %vm548_vm11 = vmpackc.low %vm468_vm6, %vm468_vm6  ;;  %v488_v7 = vld [vmem:[%s2609_s27 + $0x38] sm:$0xff]  ;;  %v489_v12 = vld [vmem:[%s2609_s27 + $0x40] sm:$0xff] }
  0x99   : > { %1756 = vmatpush3.bf16.msra.mxu0 %v2068_v19  ;;  %v565_v8 = vsel %vm547_vm10, %v485_v63, 0  ;;  %v567_v9 = vsel %vm548_vm11, %v487_v0, 0  ;;  %v566_v10 = vsel %vm547_vm10, %v486_v6, 0  ;;  %v568_v11 = vsel %vm548_vm11, %v488_v7, 0  ;;  %v491_v13 = vld [vmem:[%s2609_s27 + $0x50] sm:$0xff]  ;;  %vm2701_vm12 = vmpackc.low %vm469_vm7, %vm469_vm7  ;;  %v490_v19 = vld [vmem:[%s2609_s27 + $0x48] sm:$0xff] }
  0x9a   : > { %1820 = vmatpush3.bf16.msra.mxu1 %v2069_v20  ;;  %1757 = vmatprep.subr.bf16.mxu0 %v2070_v21  ;;  %3192 = vst [vmem:[#allocation27_spill] sm:$0xff] %v2689_v4  ;;  %3193 = vst [vmem:[#allocation28_spill] sm:$0xff] %v2691_v5  ;;  %v2707_v15 = vcombine.high %v565_v8, %v567_v9  ;;  %v2709_v16 = vcombine.high %v566_v10, %v568_v11  ;;  %v492_v20 = vld [vmem:[%s2609_s27 + $0x58] sm:$0xff]  ;;  %vm479_vm2 = vcmp.lt.s32.totalorder %v463_v28, 300  ;;  %v493_v44 = vld [vmem:[%s2609_s27 + $0x60] sm:$0xff] }
  0x9b   : > { %1821 = vmatprep.subr.bf16.mxu1 %v2071_v22  ;;  %1048 = vmatprep.mubr.bf16.mxu0 %v2687_v3  ;;  %vm2713_vm13 = vmpackc.low %vm470_vm9, %vm470_vm9  ;;  %v456_v21 = vadd.s32 %v2656_v30, %v439_v53  ;;  %v442_v22 = vadd.s32 80, %v2651_v23  ;;  %v2742_v37 = vcombine.low %v565_v8, %v567_v9  ;;  %v2744_v38 = vcombine.low %v566_v10, %v568_v11  ;;  %v495_v45 = vld [vmem:[%s2609_s27 + $0x70] sm:$0xff]  ;;  %v496_v48 = vld [vmem:[%s2609_s27 + $0x78] sm:$0xff] }
  0x9c   : > { %1145 = vmatprep.mubr.bf16.mxu1 %v2691_v5  ;;  %3196 = vst [vmem:[#allocation29_spill] sm:$0xff] %v2709_v16  ;;  %v571_v31 = vsel %vm2713_vm13, %v491_v13, 0  ;;  %v572_v33 = vsel %vm2713_vm13, %v492_v20, 0  ;;  %vm2754_vm1 = vmpackc.low %vm471_vm14, %vm471_vm14  ;;  %v509_v52 = vld [vmem:[%s2609_s27 + $0xe0] sm:$0xff]  ;;  %v511_v53 = vld [vmem:[%s2609_s27 + $0xf0] sm:$0xff] }
  0x9d   : > { %1758 = vmatpush3.bf16.msra.mxu0 %v2072_v24  ;;  %v443_v24 = vadd.s32 88, %v2651_v23  ;;  %vm472_vm15 = vcmp.lt.s32.totalorder %v456_v21, 300  ;;  %3199 = vst [vmem:[#allocation30_spill] sm:$0xff] %v2744_v38  ;;  %vm2777_vm7 = vmpackc.low %vm479_vm2, %vm479_vm2  ;;  %v573_v55 = vsel %vm2754_vm1, %v493_v44, 0  ;;  %v505_v60 = vld [vmem:[%s2609_s27 + $0xc0] sm:$0xff]  ;;  %v507_v61 = vld [vmem:[%s2609_s27 + $0xd0] sm:$0xff] }
  0x9e   : > { %1822 = vmatpush3.bf16.msra.mxu1 %v2073_v25  ;;  %1759 = vmatprep.subr.bf16.mxu0 %v2074_v26  ;;  %v461_v25 = vadd.s32 %v2656_v30, %v444_v58  ;;  %v462_v26 = vadd.s32 %v2656_v30, %v445_v59  ;;  %vm2761_vm3 = vmpackc.low %vm472_vm15, %vm472_vm15  ;;  %v589_v63 = vsel %vm2777_vm7, %v509_v52, 0  ;;  %v501_v9 = vld [vmem:[%s2609_s27 + $0xa0] sm:$0xff]  ;;  %v503_v10 = vld [vmem:[%s2609_s27 + $0xb0] sm:$0xff]  ;;  %vm2347_vm2 = vmmov 0  }
  0x9f   : > { %1823 = vmatprep.subr.bf16.mxu1 %v2075_v27  ;;  %v447_v27 = vadd.s32 120, %v2651_v23  ;;  %v575_v56 = vsel %vm2761_vm3, %v495_v45, 0  ;;  %v576_v59 = vsel %vm2761_vm3, %v496_v48, 0  ;;  %v497_v20 = vld [vmem:[%s2609_s27 + $0x80] sm:$0xff]  ;;  %v499_v21 = vld [vmem:[%s2609_s27 + $0x90] sm:$0xff]  ;;  %v502_v45 = vld [vmem:[%s2609_s27 + $0xa8] sm:$0xff] }
  0xa0   : > { %vm477_vm0 = vcmp.lt.s32.totalorder %v461_v25, 300  ;;  %vm478_vm4 = vcmp.lt.s32.totalorder %v462_v26, 300  ;;  %v1687_v8 = vcombine.high %v573_v55, %v575_v56  ;;  %v500_v25 = vld [vmem:[%s2609_s27 + $0x98] sm:$0xff] }
  0xa1   : > { %1760 = vmatpush3.bf16.msra.mxu0 %v2076_v29  ;;  %v569_v29 = vsel %vm2701_vm12, %v489_v12, 0  ;;  %vm2769_vm5 = vmpackc.low %vm477_vm0, %vm477_vm0  ;;  %v504_v46 = vld [vmem:[%s2609_s27 + $0xb8] sm:$0xff] }
  0xa2   : > { %1824 = vmatpush3.bf16.msra.mxu1 %v2077_v32  ;;  %1761 = vmatprep.subr.bf16.mxu0 %v2078_v34  ;;  %v570_v32 = vsel %vm2701_vm12, %v490_v19, 0  ;;  %v440_v34 = vadd.s32 64, %v2651_v23  ;;  %v2747_v40 = vcombine.high %v569_v29, %v571_v31  ;;  %vm2789_vm9 = vmpackc.low %vm478_vm4, %vm478_vm4  ;;  %v2813_v6 = vcombine.low %v569_v29, %v571_v31  ;;  %v2917_v62 = vld [vmem:[%s3222_s18] ss:$0 sm:$0xff]  ;;  %s2349_s18 = smov [#allocation8]  }
  0xa3   : > { %1825 = vmatprep.subr.bf16.mxu1 %v2079_v36  ;;  %v459_v36 = vadd.s32 %v2656_v30, %v442_v22  ;;  %v2815_v7 = vcombine.low %v570_v32, %v572_v33  ;;  %v585_v14 = vsel %vm2769_vm5, %v505_v60, 0  ;;  %v587_v17 = vsel %vm2789_vm9, %v507_v61, 0  ;;  %v510_v61 = vld [vmem:[%s2609_s27 + $0xe8] sm:$0xff]  ;;  %s2162_s5 = sshll.u32 %s2349_s18, 4  ;;  %s2163_s5 = int_to_ptr.vmem [resolvable:$false] %s2162_s5 }
  0xa4   : > { %v1699_v28 = vcombine.high %v585_v14, %v587_v17  ;;  %v1698_v31 = vcombine.low %v585_v14, %v587_v17  ;;  %vm1284_vm4 = vcmask 1040384   ;;  %s2164_s3 = scalar_lea.vmem %s2163_s5, 32  ;;  %p2165_p6 = scmp.lt.s32.totalorder %s1469_s26, %s2163_s5 }
  0xa5   : > { %1762 = vmatpush3.bf16.msra.mxu0 %v2080_v39  ;;  %v460_v39 = vadd.s32 %v2656_v30, %v443_v24  ;;  %vm475_vm6 = vcmp.lt.s32.totalorder %v459_v36, 300  ;;  %3215 = vst [vmem:[#allocation32_spill] sm:$0xff] %v2815_v7  ;;  %v498_v24 = vld [vmem:[%s2609_s27 + $0x88] sm:$0xff]  ;;  %v1686_v36 = vcombine.low %v573_v55, %v575_v56  ;;  %v508_v55 = vld [vmem:[%s2609_s27 + $0xd8] sm:$0xff] }
  0xa6   : > { %1826 = vmatpush3.bf16.msra.mxu1 %v2081_v41  ;;  %1763 = vmatprep.subr.bf16.mxu0 %v2082_v43  ;;  %v2749_v41 = vcombine.high %v570_v32, %v572_v33  ;;  %v464_v43 = vadd.s32 %v2656_v30, %v447_v27  ;;  %vm2807_vm14 = vmpackc.low %vm475_vm6, %vm475_vm6 }
  0xa7   : > { %1827 = vmatprep.subr.bf16.mxu1 %v2083_v47  ;;  %v494_v47 = vld [vmem:[%s2609_s27 + $0x68] sm:$0xff]  ;;  %vm476_vm8 = vcmp.lt.s32.totalorder %v460_v39, 300  ;;  %v581_v26 = vsel %vm2807_vm14, %v501_v9, 0  ;;  %v582_v48 = vsel %vm2807_vm14, %v502_v45, 0 }
  0xa8   : > { %3200 = vst [vmem:[#allocation31_spill] sm:$0xff] %v2749_v41  ;;  %vm480_vm10 = vcmp.lt.s32.totalorder %v464_v43, 300  ;;  %v574_v58 = vsel %vm2754_vm1, %v494_v47, 0  ;;  %vm2821_vm15 = vmpackc.low %vm476_vm8, %vm476_vm8 }
  0xa9   : > { %1764 = vmatpush3.bf16.msra.mxu0 %v2084_v49  ;;  %v457_v49 = vadd.s32 %v2656_v30, %v440_v34  ;;  %vm2799_vm11 = vmpackc.low %vm480_vm10, %vm480_vm10  ;;  %v2827_v13 = vcombine.high %v574_v58, %v576_v59  ;;  %v583_v27 = vsel %vm2821_vm15, %v503_v10, 0  ;;  %v2860_v39 = vcombine.low %v574_v58, %v576_v59 }
  0xaa   : > { %1828 = vmatpush3.bf16.msra.mxu1 %v2085_v50  ;;  %v458_v50 = vadd.s32 %v2656_v30, %v441_v35  ;;  %v591_v1 = vsel %vm2799_vm11, %v511_v53, 0  ;;  %v1695_v35 = vcombine.high %v581_v26, %v583_v27  ;;  %v1694_v44 = vcombine.low %v581_v26, %v583_v27  ;;  %v506_v53 = vld [vmem:[%s2609_s27 + $0xc8] sm:$0xff] }
  0xab   : > { %vm473_vm12 = vcmp.lt.s32.totalorder %v457_v49, 300  ;;  %v2825_v12 = vcombine.high %v589_v63, %v591_v1  ;;  %3218 = vst [vmem:[#allocation33_spill] sm:$0xff] %v2827_v13  ;;  %v2833_v19 = vcombine.low %v589_v63, %v591_v1  ;;  %3221 = vst [vmem:[#allocation34_spill] sm:$0xff] %v2860_v39  ;;  %v584_v49 = vsel %vm2821_vm15, %v504_v46, 0  ;;  %v512_v63 = vld [vmem:[%s2609_s27 + $0xf8] sm:$0xff]  ;;  %s2158_s27 = scalar_lea.vmem %s1469_s26, 16 }
  0xac   : > { %1049 = vmatmul.mubr.bf16.vlgmr.msra.gmra.mxu0 %v2685_v2  ;;  %vm474_vm13 = vcmp.lt.s32.totalorder %v458_v50, 300  ;;  %vm2839_vm0 = vmpackc.low %vm473_vm12, %vm473_vm12  ;;  %v2874_v52 = vcombine.high %v582_v48, %v584_v49  ;;  %v586_v56 = vsel %vm2769_vm5, %v506_v53, 0  ;;  %v588_v58 = vsel %vm2789_vm9, %v508_v55, 0  ;;  %p2159_p5 = scmp.ne.s32.totalorder %s1469_s26, %s2158_s27  ;;  %p2166_p2 = scmp.lt.s32.totalorder %s2164_s3, %s2158_s27 }
  0xad   : > { %1146 = vmatmul.mubr.bf16.vlgmr.msra.gmra.mxu1 %v2689_v4  ;;  %1056 = vmatprep.mubr.bf16.mxu0 %v2707_v15  ;;  %vm554_vm1 = vmpackc.low %vm474_vm13, %vm474_vm13  ;;  %v577_v29 = vsel %vm2839_vm0, %v497_v20, 0  ;;  %v578_v33 = vsel %vm2839_vm0, %v498_v24, 0  ;;  %v2886_v59 = vcombine.low %v582_v48, %v584_v49  ;;  %v2889_v60 = vcombine.high %v586_v56, %v588_v58 }
  0xae   : > { %1153 = vmatprep.mubr.bf16.mxu1 %v2709_v16  ;;  %1324 = vmatprep.subr.bf16.mxu1 %v2825_v12  ;;  %v579_v32 = vsel %vm554_vm1, %v499_v21, 0  ;;  %v580_v34 = vsel %vm554_vm1, %v500_v25, 0  ;;  %v592_v51 = vsel %vm2799_vm11, %v512_v63, 0  ;;  %vm1310_vm5 = vcmask 0   ;;  %p2160_p12 = pnand %p2159_p5, %p3242_p13  ;;  %p2167_p10 = por %p2166_p2, %p2165_p6 }
  0xaf   : > { %1325 = vmatpush1.bf16.msra.mxu1 %v2833_v19  ;;  %v1691_v42 = vcombine.high %v577_v29, %v579_v32  ;;  %v2862_v43 = vcombine.high %v578_v33, %v580_v34  ;;  %v1690_v47 = vcombine.low %v577_v29, %v579_v32  ;;  %v2872_v50 = vcombine.low %v578_v33, %v580_v34 }
  0xb0   : > { %1326 = vmatprep.subr.bf16.mxu1 %v1699_v28  ;;  %p2161_p3 = pneg %p2160_p12 }
  0xb2   : > { %p2168_p11 = pnand %p2167_p10, %p2161_p3 }
  0xb3   : > { %1327 = vmatpush1.bf16.msra.mxu1 %v1698_v31 }
  0xb4   : > { %1057 = vmatmul.mubr.bf16.gmra.mxu0 %v2742_v37  ;;  %1328 = vmatprep.subr.bf16.mxu1 %v1695_v35 }
  0xb5   : > { %1154 = vmatmul.mubr.bf16.gmra.mxu1 %v2744_v38  ;;  %1064 = vmatprep.mubr.bf16.mxu0 %v2747_v40 }
  0xb6   : > { %1161 = vmatprep.mubr.bf16.mxu1 %v2749_v41 }
  0xb7   : > { %1329 = vmatpush1.bf16.msra.mxu1 %v1694_v44 }
  0xb8   : > { %1330 = vmatprep.subr.bf16.mxu1 %v1691_v42 }
  0xbb   : > { %1331 = vmatpush1.bf16.msra.mxu1 %v1690_v47 }
  0xbc   : > { %1065 = vmatmul.mubr.bf16.gmra.mxu0 %v2813_v6  ;;  %1332 = vmatprep.subr.bf16.mxu1 %v1687_v8 }
  0xbd   : > { %1162 = vmatmul.mubr.bf16.gmra.mxu1 %v2815_v7  ;;  %1072 = vmatprep.mubr.bf16.mxu0 %v1687_v8 }
  0xbe   : > { %1169 = vmatprep.mubr.bf16.mxu1 %v2827_v13 }
  0xbf   : > { %1333 = vmatpush1.bf16.msra.mxu1 %v1686_v36 }
  0xc0   : > { %1334 = vmatprep.subr.bf16.mxu1 %v2747_v40  ;;  %v590_v40 = vsel %vm2777_vm7, %v510_v61, 0 }
  0xc1   : > { %v2904_v57 = vcombine.high %v590_v40, %v592_v51 }
  0xc3   : > { %1335 = vmatpush1.bf16.msra.mxu1 %v2813_v6 }
  0xc4   : > { %1073 = vmatmul.mubr.bf16.gmra.mxu0 %v1686_v36  ;;  %1336 = vmatprep.subr.bf16.mxu1 %v2707_v15  ;;  %v2902_v15 = vcombine.low %v586_v56, %v588_v58 }
  0xc5   : > { %1170 = vmatmul.mubr.bf16.gmra.mxu1 %v2860_v39  ;;  %1080 = vmatprep.mubr.bf16.mxu0 %v1691_v42 }
  0xc6   : > { %1177 = vmatprep.mubr.bf16.mxu1 %v2862_v43 }
  0xc7   : > { %1337 = vmatpush1.bf16.msra.mxu1 %v2742_v37  ;;  %v2909_v37 = vcombine.low %v590_v40, %v592_v51 }
  0xc8   : > { %1338 = vmatprep.subr.bf16.mxu1 %v2687_v3  ;;  %v3150_v3 = vmov 0.0  }
  0xc9   : > { %1886 = vmatprep.subr.bf16.mxu0 %v3150_v3 }
  0xcb   : > { %1339 = vmatpush1.bf16.msra.mxu1 %v2685_v2 }
  0xcc   : > { %1081 = vmatmul.mubr.bf16.gmra.mxu0 %v1690_v47 }
  0xcd   : > { %1178 = vmatmul.mubr.bf16.gmra.mxu1 %v2872_v50  ;;  %1088 = vmatprep.mubr.bf16.mxu0 %v1695_v35 }
  0xce   : > { %1185 = vmatprep.mubr.bf16.mxu1 %v2874_v52 }
  0xd4   : > { %1089 = vmatmul.mubr.bf16.gmra.mxu0 %v1694_v44 }
  0xd5   : > { %1186 = vmatmul.mubr.bf16.gmra.mxu1 %v2886_v59  ;;  %1096 = vmatprep.mubr.bf16.mxu0 %v1699_v28 }
  0xd6   : > { %1193 = vmatprep.mubr.bf16.mxu1 %v2889_v60 }
  0xdc   : > { %1097 = vmatmul.mubr.bf16.gmra.mxu0 %v1698_v31 }
  0xdd   : > { %1194 = vmatmul.mubr.bf16.gmra.mxu1 %v2902_v15  ;;  %1104 = vmatprep.mubr.bf16.mxu0 %v2825_v12 }
  0xde   : > { %1201 = vmatprep.mubr.bf16.mxu1 %v2904_v57 }
  0xe4   : > { %1105 = vmatmul.mubr.bf16.gmra.mxu0 %v2833_v19 }
  0xe5   : > { %1202 = vmatmul.mubr.bf16.gmra.mxu1 %v2909_v37  ;;  %1902 = vmatprep.mubr.msk.bf16.mxu0 %vm2347_vm2, %v3150_v3 }
 0x16c   : > { %v1765_v2 = vpop.f32.mrf.mxu0 }
 0x16d   : > { %v1829_v54 = vpop.f32.mrf.mxu1 }
 0x16e   : > { %v1766_v0 = vpop.f32.mrf.mxu0 }
 0x16f   : > { %v1830_v1 = vpop.f32.mrf.mxu1  ;;  %v1767_v6 = vadd.f32 %v1766_v0, %v1765_v2  ;;  %v1227_v2 = vld [vmem:[#allocation2] sm:$0x1] }
 0x170   : > { %v1831_v8 = vadd.f32 %v1830_v1, %v1829_v54  ;;  %v1768_v9 = vpop.f32.mrf.mxu0  ;;  %v3149_v1 = vmov 0  }
 0x171   : > { %v1832_v10 = vpop.f32.mrf.mxu1  ;;  %v1051_v11 = vadd.f32 %v1767_v6, %v2917_v62  ;;  %2052 = vset.pattern.permute.xlu0 %v3149_v1  ;;  %2053 = vset.pattern.permute.xlu1 %v3149_v1 }
 0x172   : > { %v1769_v12 = vpop.f32.mrf.mxu0  ;;  %1230 = vperm.xlu0 %2052, %v1227_v2   ;;  %1356 = vmatprep.mubr.bf16.mxu1 %v3149_v1 }
 0x173   : > { %v1833_v14 = vpop.f32.mrf.mxu1  ;;  %v2920_v17 = vadd.f32 %v1831_v8, %v1051_v11  ;;  %v1770_v19 = vadd.f32 %v1769_v12, %v1768_v9 }
 0x174   : > { %v1834_v20 = vadd.f32 %v1833_v14, %v1832_v10  ;;  %v1771_v21 = vpop.f32.mrf.mxu0 }
 0x175   : > { %v1835_v22 = vpop.f32.mrf.mxu1  ;;  %v1054_v24 = vadd.f32 %v1770_v19, %v2917_v62 }
 0x176   : > { %v1772_v25 = vpop.f32.mrf.mxu0 }
 0x177   : > { %v1836_v26 = vpop.f32.mrf.mxu1  ;;  %v2923_v27 = vadd.f32 %v1834_v20, %v1054_v24  ;;  %v1773_v28 = vadd.f32 %v1772_v25, %v1771_v21 }
 0x178   : > { %v1837_v29 = vadd.f32 %v1836_v26, %v1835_v22  ;;  %v1774_v31 = vpop.f32.mrf.mxu0 }
 0x179   : > { %v1838_v32 = vpop.f32.mrf.mxu1  ;;  %v1059_v34 = vadd.f32 %v1773_v28, %v2917_v62 }
 0x17a   : > { %v1775_v35 = vpop.f32.mrf.mxu0 }
 0x17b   : > { %v1839_v36 = vpop.f32.mrf.mxu1  ;;  %v2928_v42 = vadd.f32 %v1837_v29, %v1059_v34  ;;  %v1776_v44 = vadd.f32 %v1775_v35, %v1774_v31 }
 0x17c   : > { %v1840_v45 = vadd.f32 %v1839_v36, %v1838_v32  ;;  %v1777_v46 = vpop.f32.mrf.mxu0 }
 0x17d   : > { %v1841_v47 = vpop.f32.mrf.mxu1  ;;  %v1062_v48 = vadd.f32 %v1776_v44, %v2917_v62 }
 0x17e   : > { %v1778_v49 = vpop.f32.mrf.mxu0 }
 0x17f   : > { %v1842_v53 = vpop.f32.mrf.mxu1  ;;  %v2932_v55 = vadd.f32 %v1840_v45, %v1062_v48  ;;  %v1779_v56 = vadd.f32 %v1778_v49, %v1777_v46 }
 0x180   : > { %v1843_v58 = vadd.f32 %v1842_v53, %v1841_v47  ;;  %v1780_v61 = vpop.f32.mrf.mxu0 }
 0x181   : > { %v1844_v63 = vpop.f32.mrf.mxu1  ;;  %v1067_v51 = vadd.f32 %v1779_v56, %v2917_v62 }
 0x182   : > { %v1781_v54 = vpop.f32.mrf.mxu0 }
 0x183   : > { %v1845_v0 = vpop.f32.mrf.mxu1  ;;  %v2939_v6 = vadd.f32 %v1843_v58, %v1067_v51  ;;  %v1782_v8 = vadd.f32 %v1781_v54, %v1780_v61 }
 0x184   : > { %v1846_v9 = vadd.f32 %v1845_v0, %v1844_v63  ;;  %v1783_v10 = vpop.f32.mrf.mxu0 }
 0x185   : > { %v1847_v11 = vpop.f32.mrf.mxu1  ;;  %v1070_v12 = vadd.f32 %v1782_v8, %v2917_v62 }
 0x186   : > { %v1784_v14 = vpop.f32.mrf.mxu0 }
 0x187   : > { %v1848_v19 = vpop.f32.mrf.mxu1  ;;  %v2943_v20 = vadd.f32 %v1846_v9, %v1070_v12  ;;  %v1785_v21 = vadd.f32 %v1784_v14, %v1783_v10 }
 0x188   : > { %v1849_v22 = vadd.f32 %v1848_v19, %v1847_v11  ;;  %v1786_v24 = vpop.f32.mrf.mxu0 }
 0x189   : > { %v1850_v25 = vpop.f32.mrf.mxu1  ;;  %v1075_v28 = vadd.f32 %v1785_v21, %v2917_v62 }
 0x18a   : > { %v1787_v29 = vpop.f32.mrf.mxu0 }
 0x18b   : > { %v1851_v31 = vpop.f32.mrf.mxu1  ;;  %v2948_v32 = vadd.f32 %v1849_v22, %v1075_v28  ;;  %v1788_v34 = vadd.f32 %v1787_v29, %v1786_v24 }
 0x18c   : > { %v1852_v35 = vadd.f32 %v1851_v31, %v1850_v25  ;;  %v2950_v36 = vpop.f32.mrf.mxu0 }
 0x18d   : > { %v2952_v44 = vpop.f32.mrf.mxu1  ;;  %v1078_v45 = vadd.f32 %v1788_v34, %v2917_v62 }
 0x18e   : > { %v1790_v46 = vpop.f32.mrf.mxu0 }
 0x18f   : > { %v2955_v47 = vpop.f32.mrf.mxu1  ;;  %v2957_v48 = vadd.f32 %v1852_v35, %v1078_v45 }
 0x190   : > { %v1792_v49 = vpop.f32.mrf.mxu0 }
 0x191   : > { %v1856_v53 = vpop.f32.mrf.mxu1 }
 0x192   : > { %v1793_v58 = vpop.f32.mrf.mxu0 }
 0x193   : > { %v1857_v61 = vpop.f32.mrf.mxu1 }
 0x194   : > { %v1795_v63 = vpop.f32.mrf.mxu0 }
 0x195   : > { %v1859_v51 = vpop.f32.mrf.mxu1 }
 0x196   : > { %v1796_v2 = vpop.f32.mrf.mxu0 }
 0x197   : > { %v1860_v54 = vpop.f32.mrf.mxu1 }
 0x198   : > { %v1798_v0 = vpop.f32.mrf.mxu0 }
 0x199   : > { %v1862_v8 = vpop.f32.mrf.mxu1 }
 0x19a   : > { %v1799_v9 = vpop.f32.mrf.mxu0 }
 0x19b   : > { %v1863_v10 = vpop.f32.mrf.mxu1  ;;  %v1800_v41 = vadd.f32 %v1799_v9, %v1798_v0 }
 0x19c   : > { %v1801_v11 = vpop.f32.mrf.mxu0 }
 0x19d   : > { %v1865_v12 = vpop.f32.mrf.mxu1 }
 0x19e   : > { %v1802_v14 = vpop.f32.mrf.mxu0 }
 0x19f   : > { %v1866_v19 = vpop.f32.mrf.mxu1  ;;  %v1803_v3 = vadd.f32 %v1802_v14, %v1801_v11 }
 0x1a0   : > { %v1804_v21 = vpop.f32.mrf.mxu0  ;;  %v1867_v39 = vadd.f32 %v1866_v19, %v1865_v12 }
 0x1a1   : > { %v1868_v22 = vpop.f32.mrf.mxu1  ;;  %v1099_v7 = vadd.f32 %v1803_v3, %v2917_v62 }
 0x1a2   : > { %v1805_v24 = vpop.f32.mrf.mxu0 }
 0x1a3   : > { %v1869_v25 = vpop.f32.mrf.mxu1  ;;  %v1806_v40 = vadd.f32 %v1805_v24, %v1804_v21  ;;  %v1797_v21 = vadd.f32 %v1796_v2, %v1795_v63  ;;  %v1196_v24 = vadd.f32 %v1867_v39, %v1099_v7  ;;  %v1858_v7 = vadd.f32 %v1857_v61, %v1856_v53  ;;  %v3234_v61 = vld [vmem:[#allocation29_spill] sm:$0xff]  ;;  %v3240_v2 = vld [vmem:[#allocation26_spill] sm:$0xff] }
 0x1a4   : > { %v1807_v28 = vpop.f32.mrf.mxu0  ;;  %v3223_v39 = vmov 0.0   ;;  %v3226_v53 = vpack.c.bf16 %v2932_v55, %v2928_v42  ;;  %v1226_v42 = vld [vmem:[%s3228_s23] sm:$0x1]  ;;  %v3229_v55 = vmov 0  }
 0x1a5   : > { %v1871_v29 = vpop.f32.mrf.mxu1  ;;  %v1102_v5 = vadd.f32 %v1806_v40, %v2917_v62  ;;  %v1861_v40 = vadd.f32 %v1860_v54, %v1859_v51 }
 0x1a6   : > { %v1808_v31 = vpop.f32.mrf.mxu0 }
 0x1a7   : > { %v1872_v34 = vpop.f32.mrf.mxu1  ;;  %v1809_v35 = vadd.f32 %v1808_v31, %v1807_v28  ;;  %v1870_v28 = vadd.f32 %v1869_v25, %v1868_v22  ;;  %v1283_v25 = vld [vmem:[%s2632_s28] sm:$0x1] }
 0x1a8   : > { %v1810_v45 = vpop.f32.mrf.mxu0  ;;  %v1873_v30 = vadd.f32 %v1872_v34, %v1871_v29 }
 0x1a9   : > { %v1874_v18 = vpop.f32.mrf.mxu1  ;;  %v1107_v26 = vadd.f32 %v1809_v35, %v2917_v62  ;;  %v1199_v13 = vadd.f32 %v1870_v28, %v1102_v5 }
 0x1aa   : > { %v1811_v1 = vpop.f32.mrf.mxu0 }
 0x1ab   : > { %v1875_v33 = vpop.f32.mrf.mxu1  ;;  %v1812_v56 = vadd.f32 %v1811_v1, %v1810_v45  ;;  %v1204_v38 = vadd.f32 %v1873_v30, %v1107_v26  ;;  %v1094_v1 = vadd.f32 %v1800_v41, %v2917_v62  ;;  %v1216_v11 = vpack.c.bf16 %v1199_v13, %v1196_v24 }
 0x1ac   : > { %v1876_v4 = vadd.f32 %v1875_v33, %v1874_v18  ;;  %v1864_v18 = vadd.f32 %v1863_v10, %v1862_v8  ;;  %v1794_v33 = vadd.f32 %v1793_v58, %v1792_v49  ;;  %v1855_v41 = vadd.f32 %v2955_v47, %v2952_v44 }
 0x1ad   : > { %v1110_v23 = vadd.f32 %v1812_v56, %v2917_v62  ;;  %v1091_v56 = vadd.f32 %v1797_v21, %v2917_v62 }
 0x1ae   : > { %v1191_v30 = vadd.f32 %v1864_v18, %v1094_v1 }
 0x1af   : > { %v1207_v16 = vadd.f32 %v1876_v4, %v1110_v23  ;;  %v1791_v23 = vadd.f32 %v1790_v46, %v2950_v36  ;;  %v1188_v4 = vadd.f32 %v1861_v40, %v1091_v56  ;;  %v3225_v46 = vpack.c.bf16 %v2943_v20, %v2939_v6 }
 0x1b1   : > { %v1217_v31 = vpack.c.bf16 %v1207_v16, %v1204_v38  ;;  %v1086_v16 = vadd.f32 %v1794_v33, %v2917_v62  ;;  %v1215_v38 = vpack.c.bf16 %v1191_v30, %v1188_v4  ;;  %v1083_v3 = vadd.f32 %v1791_v23, %v2917_v62 }
 0x1b2   : > { %v3224_v62 = vpack.c.bf16 %v2957_v48, %v2948_v32  ;;  %v3227_v48 = vpack.c.bf16 %v2923_v27, %v2920_v17  ;;  %v3231_v17 = vld [vmem:[#allocation34_spill] sm:$0xff]  ;;  %v3232_v27 = vld [vmem:[#allocation31_spill] sm:$0xff] }
 0x1b3   : > { %2086 = vtanh.bf16 %v1217_v31  ;;  %v1183_v13 = vadd.f32 %v1858_v7, %v1086_v16  ;;  %v1180_v26 = vadd.f32 %v1855_v41, %v1083_v3 }
 0x1b4   : > { %2088 = vtanh.bf16 %v1216_v11 }
 0x1b5   : > { %2090 = vtanh.bf16 %v1215_v38  ;;  %v1214_v49 = vpack.c.bf16 %v1183_v13, %v1180_v26 }
 0x1b7   : > { %2092 = vtanh.bf16 %v1214_v49 }
 0x1b8   : > { %2094 = vtanh.bf16 %v3224_v62 }
 0x1b9   : > { %2096 = vtanh.bf16 %v3225_v46 }
 0x1ba   : > { %2098 = vtanh.bf16 %v3226_v53 }
 0x1bb   : > { %2100 = vtanh.bf16 %v3227_v48 }
 0x1c1   : > { %v2087_v5 = vpop.eup %2086 }
 0x1c2   : > { %1887 = vmatpush3.bf16.xpose.msra.mxu0 %v2087_v5  ;;  %v2089_v58 = vpop.eup %2088 }
 0x1c3   : > { %1888 = vmatprep.subr.bf16.mxu0 %v3223_v39  ;;  %v2091_v36 = vpop.eup %2090 }
 0x1c5   : > { %v2093_v44 = vpop.eup %2092 }
 0x1c6   : > { %v2095_v47 = vpop.eup %2094 }
 0x1c7   : > { %v2097_v32 = vpop.eup %2096 }
 0x1c8   : > { %v2099_v6 = vpop.eup %2098 }
 0x1c9   : > { %v2101_v20 = vpop.eup %2100 }
 0x1ca   : > { %1889 = vmatpush3.bf16.xpose.msra.mxu0 %v2089_v58 }
 0x1cb   : > { %1890 = vmatprep.subr.bf16.mxu0 %v3223_v39 }
 0x1d2   : > { %1891 = vmatpush3.bf16.xpose.msra.mxu0 %v2091_v36 }
 0x1d3   : > { %1892 = vmatprep.subr.bf16.mxu0 %v3223_v39 }
 0x1da   : > { %1893 = vmatpush3.bf16.xpose.msra.mxu0 %v2093_v44 }
 0x1db   : > { %1894 = vmatprep.subr.bf16.mxu0 %v3223_v39 }
 0x1e2   : > { %1895 = vmatpush3.bf16.xpose.msra.mxu0 %v2095_v47 }
 0x1e3   : > { %1896 = vmatprep.subr.bf16.mxu0 %v3223_v39 }
 0x1ea   : > { %1897 = vmatpush3.bf16.xpose.msra.mxu0 %v2097_v32 }
 0x1eb   : > { %1898 = vmatprep.subr.bf16.mxu0 %v3223_v39 }
 0x1ed   : > { %v1231_v51 = vpop.permute.xlu0 %1230 }
 0x1f2   : > { %1899 = vmatpush3.bf16.xpose.msra.mxu0 %v2099_v6 }
 0x1f3   : > { %1900 = vmatprep.subr.bf16.mxu0 %v3223_v39 }
 0x1fa   : > { %1901 = vmatpush3.bf16.xpose.msra.mxu0 %v2101_v20 }
 0x1fb   : > { %1365 = vmatprep.subr.bf16.mxu0 %v2904_v57  ;;  %v3230_v57 = vld [vmem:[#allocation33_spill] sm:$0xff] }
 0x201   : > { %1903 = vmatmul.mubr.bf16.vlgmr.msra.gmra.mxu0 %v1226_v42 }
 0x202   : > { %1366 = vmatpush1.bf16.msra.mxu0 %v2909_v37  ;;  %1397 = vmatprep.mubr.bf16.mxu0 %v3229_v55  ;;  %v3233_v37 = vld [vmem:[#allocation32_spill] sm:$0xff] }
 0x203   : > { %1367 = vmatprep.subr.bf16.mxu0 %v2889_v60  ;;  %v3235_v60 = vld [vmem:[#allocation30_spill] sm:$0xff] }
 0x206   : > { %1368 = vmatpush1.bf16.msra.mxu0 %v2902_v15 }
 0x207   : > { %1369 = vmatprep.subr.bf16.mxu0 %v2874_v52  ;;  %v3236_v52 = vld [vmem:[#allocation28_spill] sm:$0xff] }
 0x20a   : > { %1370 = vmatpush1.bf16.msra.mxu0 %v2886_v59  ;;  %v3237_v59 = vld [vmem:[#allocation27_spill] sm:$0xff] }
 0x20b   : > { %1371 = vmatprep.subr.bf16.mxu0 %v2862_v43  ;;  %v3238_v43 = vlaneseq }
 0x20d   : > { %v1278_v15 = vand.u32 127, %v3238_v43 }
 0x20e   : > { %1372 = vmatpush1.bf16.msra.mxu0 %v2872_v50  ;;  %v3239_v50 = vld [vmem:[#allocation25_spill] sm:$0xff] }
 0x20f   : > { %1373 = vmatprep.subr.bf16.mxu0 %v3230_v57  ;;  %v3013_v63 = vsub.s32 0, %v3239_v50  ;;  %v1279_v54 = vadd.s32 %v1278_v15, %v3240_v2 }
 0x211   : > { %v1236_v0 = vrot.slane %v1231_v51, %v3013_v63  ;;  %vm1280_vm3 = vcmp.lt.s32.totalorder %v1279_v54, 300 }
 0x212   : > { %1374 = vmatpush1.bf16.msra.mxu0 %v3231_v17 }
 0x213   : > { %1375 = vmatprep.subr.bf16.mxu0 %v3232_v27 }
 0x216   : > { %1376 = vmatpush1.bf16.msra.mxu0 %v3233_v37 }
 0x217   : > { %1377 = vmatprep.subr.bf16.mxu0 %v3234_v61 }
 0x21a   : > { %1378 = vmatpush1.bf16.msra.mxu0 %v3235_v60 }
 0x21b   : > { %1379 = vmatprep.subr.bf16.mxu0 %v3236_v52 }
 0x21e   : > { %1380 = vmatpush1.bf16.msra.mxu0 %v3237_v59 }
 0x2c1   : > { %v1271_v8 = vpop.f32.mrf.mxu0 }
 0x2c2   : > { %v1272_v9 = vadd.f32 %v1271_v8, %v1236_v0 }
 0x2c3   : > { %v1904_v10 = vpop.f32.mrf.mxu0 }
 0x2c4   : > { %v1281_v12 = vsel %vm1280_vm3, %v1272_v9, -1e+30 }
 0x2c5   : > { %1282 = vst [vmem:[%s2642_s24] sm:$0x1] %v1281_v12  ;;  %v1274_v14 = vpop.f32.mrf.mxu0  ;;  %v1285_v19 = vsel %vm1284_vm4, %v1281_v12, -inf }
 0x2c6   : > { %1286 = vmax.xlane.f32.xlu0 %v1285_v19 }
 0x2c7   : > { %v1905_v22 = vpop.f32.mrf.mxu0 }
 0x34f   : > { %v1287_v29 = vpop.xlane.xlu0 %1286 }
 0x350   : > { %v1288_v34 = vmax.f32 %v1283_v25, %v1287_v29 }
 0x352   : > { %v1289_v35 = vsub.f32 %v1283_v25, %v1288_v34  ;;  %1441 = vst.msk [vmem:[%s2632_s28] sm:$0x1] %vm1310_vm5, %v1288_v34  ;;  %1294 = vperm.xlu1 %2053, %v1288_v34  }
 0x354   : > { %v1290_v45 = vmul.f32 1.442695, %v1289_v35 }
 0x356   : > { %2102 = vpow2.f32 %v1290_v45 }
 0x363   : > { %v2103_v28 = vpop.eup %2102 }
 0x364   : > { %1315 = vperm.xlu0 %2052, %v2103_v28  }
 0x3cd   : > { %v1295_v31 = vpop.permute.xlu1 %1294 }
 0x3ce   : > { %v1300_v21 = vrot.slane %v1295_v31, %v3013_v63 }
 0x3d0   : > { %v1301_v24 = vsub.f32 %v1281_v12, %v1300_v21 }
 0x3d2   : > { %v1302_v1 = vmul.f32 1.442695, %v1301_v24 }
 0x3d4   : > { %2104 = vpow2.f32 %v1302_v1 }
 0x3e1   : > { %v2105_v11 = vpop.eup %2104 }
 0x3e2   : > { %v1306_v56 = vsel %vm1284_vm4, %v2105_v11, 0.0  ;;  %v1323_v18 = vpack.c.bf16 %v2105_v11, %v2105_v11 }
 0x3e3   : > { %1307 = vadd.xlane.f32.xlu1 %v1306_v56 }
 0x3e4   : > { %1357 = vmatmul.mubr.bf16.vlgmr.msra.gmra.mxu1 %v1323_v18  ;;  %1398 = vmatmul.mubr.bf16.vlgmr.msra.gmra.mxu0 %v1323_v18 }
 0x3e5   : > { %2171 = shalt.err (!%p2168_p11)
}
 0x3e6   : > { %s2172_s12 = scalar_lea.hbm %s1466_s20, 16  ;;  %s2176_s23 = scalar_lea.hbm %s3241_s7, 64 }
 0x3e7   : > { %p2173_p0 = scmp.ne.s32.totalorder %s1466_s20, %s2172_s12  ;;  %p2177_p8 = scmp.lt.s32.totalorder %s1466_s20, %s3241_s7 }
 0x3e8   : > { %p2178_p9 = scmp.lt.s32.totalorder %s2176_s23, %s2172_s12 }
 0x3e9   : > { %p2174_p1 = pnand %p2173_p0, %p3242_p13 }
 0x3ea   : > { %p2179_p7 = por %p2178_p9, %p2177_p8 }
 0x3eb   : > { %p2175_p4 = pneg %p2174_p1 }
 0x3ed   : > { %p2180_p5 = pnand %p2179_p7, %p2175_p4 }
 0x3ef   : > { %2183 = shalt.err (!%p2180_p5)
}
 0x3f0   : > { %1911 = dma.vmem_to_hbm [thread:$0]  (%p3242_p13), %s1469_s26, 16, %s1466_s20, %s1443_s15   ;;  %v1304_v33 = vld [vmem:[%s2637_s9] sm:$0x1]  ;;  %v2350_v4 = vmov 1966171168   ;;  %v1316_v7 = vpop.permute.xlu0 %1315  ;;  %vm1438_vm6 = vcmp.lt.s32.totalorder %v3238_v43, 512 }
 0x3f1   : > { %v1305_v40 = vmul.f32 %v2103_v28, %v1304_v33  ;;  %v1413_v16 = vunpack.c.l.s4 %v2350_v4  ;;  %v1321_v62 = vrot.slane %v1316_v7, %v3013_v63  ;;  %v1312_v47 = vld [vmem:[%s2644_s2] sm:$0xf]  ;;  %s1748_s25 = sshll.u32 %s2324_s16, 6  ;;  %s3243_s26 = sld [smem:[#allocation39_spill]] }
 0x3f2   : > { %s3244_s27 = sand.u32 1, %s2288_s30   ;;  %p3245_p12 = scmp.ne.s32.totalorder %s3185_s10, 0 }
 0x3f3   : > { %v1414_v38 = vunpack.c.0.s8 %v1413_v16  ;;  %v1322_v6 = vmul.f32 %v1321_v62, %v1312_v47  ;;  %s1453_s18 = scalar_lea.sflag [#allocation10], %s3244_s27  ;;  %s2351_s16 = smov [#allocation9]  }
 0x3f4   : > { %s2188_s3 = sshll.u32 %s2351_s16, 4  ;;  %s2189_s3 = int_to_ptr.vmem [resolvable:$false] %s2188_s3 }
 0x3f5   : > { %v1417_v41 = vsub.s32 %v1414_v38, %v3239_v50  ;;  %s2190_s12 = scalar_lea.vmem %s2189_s3, 128 }
 0x3f7   : > { %s1486_s15 = scalar_lea.hbm %s3243_s26, %s1748_s25 }
 0x46c   : > { %v1308_v30 = vpop.xlane.xlu1 %1307 }
 0x46d   : > { %v1309_v23 = vadd.f32 %v1308_v30, %v1305_v40 }
 0x46f   : > { %1311 = vst.msk [vmem:[%s2637_s9] sm:$0x1] %vm1310_vm5, %v1309_v23  ;;  %s1488_s9 = sshll.u32 %s2644_s2, 4  ;;  %s1489_s9 = int_to_ptr.vmem [resolvable:$true] %s1488_s9 }
 0x470   : > { %s2184_s5 = scalar_lea.vmem %s1489_s9, 64  ;;  %p2191_p2 = scmp.lt.s32.totalorder %s1489_s9, %s2189_s3 }
 0x471   : > { %p2185_p13 = scmp.ne.s32.totalorder %s1489_s9, %s2184_s5  ;;  %p2192_p10 = scmp.lt.s32.totalorder %s2190_s12, %s2184_s5 }
 0x473   : > { %p2186_p3 = pnand %p2185_p13, %p3245_p12  ;;  %p2193_p11 = por %p2192_p10, %p2191_p2 }
 0x475   : > { %p2187_p6 = pneg %p2186_p3 }
 0x477   : > { %p2194_p0 = pnand %p2193_p11, %p2187_p6 }
 0x4a4   : > { %v1358_v5 = vpop.f32.mrf.mxu1  ;;  %v1399_v3 = vpop.f32.mrf.mxu0 }
 0x4a6   : > { %v1360_v13 = vpop.f32.mrf.mxu1  ;;  %v1401_v39 = vpop.f32.mrf.mxu0 }
 0x4a7   : > { %v1410_v26 = vcombine.low %v1358_v5, %v1360_v13  ;;  %v1411_v49 = vcombine.low %v1399_v3, %v1401_v39 }
 0x4a8   : > { %v1362_v58 = vpop.f32.mrf.mxu1  ;;  %v1403_v36 = vpop.f32.mrf.mxu0 }
 0x4a9   : > { %v1418_v44 = vrot.slane %v1410_v26, %v1417_v41  ;;  %v1425_v46 = vrot.slane %v1411_v49, %v1417_v41 }
 0x4aa   : > { %v1363_v53 = vpop.f32.mrf.mxu1  ;;  %v1404_v32 = vpop.f32.mrf.mxu0 }
 0x4ab   : > { %v1426_v48 = vcombine.low %v1418_v44, %v1425_v46 }
 0x4ad   : > { %v1433_v20 = vrot.slane %v1426_v48, %v1417_v41 }
 0x4af   : > { %v1435_v42 = vadd.f32 %v1433_v20, %v1322_v6 }
 0x4b1   : > { %1440 = vst.msk [vmem:[%s2644_s2] sm:$0xf] %vm1438_vm6, %v1435_v42 }
 0x4b2   : > { %2197 = shalt.err (!%p2194_p0)
}
 0x4b3   : > { %s2198_s22 = scalar_lea.hbm %s1486_s15, 64  ;;  %s2202_s23 = scalar_lea.hbm %s3243_s26, 128 }
 0x4b4   : > { %p2199_p1 = scmp.ne.s32.totalorder %s1486_s15, %s2198_s22  ;;  %p2203_p9 = scmp.lt.s32.totalorder %s1486_s15, %s3243_s26 }
 0x4b5   : > { %p2204_p7 = scmp.lt.s32.totalorder %s2202_s23, %s2198_s22 }
 0x4b6   : > { %p2200_p4 = pnand %p2199_p1, %p3245_p12 }
 0x4b7   : > { %p2205_p5 = por %p2204_p7, %p2203_p9 }
 0x4b8   : > { %p2201_p8 = pneg %p2200_p4 }
 0x4ba   : > { %p2206_p13 = pnand %p2205_p5, %p2201_p8 }
 0x4bc   : > { %2209 = shalt.err (!%p2206_p13)
}
 0x4bd   : > { %1912 = dma.vmem_to_hbm [thread:$0]  (%p3245_p12), %s1489_s9, 64, %s1486_s15, %s1453_s18  }
 0x4be PF: > { %s3246_s25 = sld [smem:[#allocation16_spill]]  ;;  %p1928_p3 = scmp.ge.s32.totalorder %s2336_s19, 2 }
 0x4bf   : > { %p3247_p6 = scmp.ne.s32.totalorder %s3183_s17, 0 }
 0x4c1   : > { %p1920_p2 = pnand %p1928_p3, %p3247_p6 }
 0x4c3   : > { %p1921_p10 = pneg %p1920_p2 }
 0x4c4   : > { %s1500_s4 = sand.u32 1, %s3246_s25  }
 0x4c5   : > { %s1501_s20 = scalar_lea.sflag [#allocation5], %s1500_s4 }
 0x4c6   : > { %2275 = dma.done.wait (%p1921_p10), %s1501_s20, 16  }
 0x4c7   : > { %2277 = vsyncadd (%p1921_p10), %s1501_s20, 4294967280  ;;  %s1520_s27 = sand.u32 1, %s2284_s29   ;;  %p3248_p11 = scmp.ne.s32.totalorder %s3186_s8, 0 }
 0x4c8   : > { %s1521_s10 = scalar_lea.sflag [#allocation10], %s1520_s27 }
 0x4c9   : > { %p1923_p0 = pnand %p1928_p3, %p3248_p11 }
 0x4cb   : > { %p1924_p1 = pneg %p1923_p0 }
 0x4cd   : > { %2279 = dma.done.wait (%p1924_p1), %s1521_s10, 64  }
 0x4ce   : > { %2281 = vsyncadd (%p1924_p1), %s1521_s10, 4294967232  ;;  %s31_s19 = sadd.s32 1, %s2336_s19   ;;  %s3250_s17 = sld [smem:[#allocation15_spill]] }
 0x4cf   : > { %p3078_p12 = scmp.ge.s32.totalorder %s31_s19, 6   ;;  %s3251_s15 = sld [smem:[#allocation24_spill]] }
 0x4d0   : > { %s3252_s18 = sld [smem:[#allocation17_spill]]  ;;  %s3260_s29 = smov %s2288_s30 }
 0x4d1   : > { %s3253_s12 = sld [smem:[#allocation22_spill]]  ;;  %s3263_s10 = smov %s2300_s11 }
 0x4d2   : > { %s3254_s8 = sld [smem:[#allocation23_spill]]  ;;  %s3265_s4 = smov %s2312_s13 }
 0x4d3   : > { %s3255_s5 = sld [smem:[#allocation18_spill]]  ;;  %s3266_s13 = smov %s2316_s14 }
 0x4d4   : > { %s3256_s16 = sld [smem:[#allocation19_spill]]  ;;  %s3261_s30 = smov %s3250_s17 }
 0x4d5   : > { %s3257_s3 = sld [smem:[#allocation20_spill]]  ;;  %s3262_s9 = smov %s3251_s15 }
 0x4d6   : > { %s3258_s22 = sld [smem:[#allocation21_spill]]  ;;  %s3264_s11 = smov %s3252_s18 }
 0x4d8   : > { %s3267_s14 = smov %s3254_s8  ;;  %30 = sbr.rel (!%p3078_p12) target bundleno = 19 (0x13), region = 134 }
 0x4d9   : > { %s3268_s15 = smov %s3255_s5 }
 0x4db   : > { %s3269_s17 = smov %s3257_s3 }
 0x4dc   : > { %s3270_s18 = smov %s3258_s22 }
 0x4dd   :  { %1526 = vsyncpa [#allocation4], 1 }
 0x4de   :  { %1528 = vsyncpa [#allocation4 + $0x1], 1 }
 0x4df   :  { %1529 = vsyncpa [#allocation7], 1 }
 0x4e0   :  { %1530 = vsyncpa [#allocation5], 1 }
 0x4e1   :  { %1532 = vsyncpa [#allocation5 + $0x1], 1 }
 0x4e2   :  { %1533 = vsyncpa [#allocation10], 1 }
 0x4e3   :  { %1535 = vsyncpa [#allocation10 + $0x1], 1 }

</bundles_post_ra>
